<compile_context>
chip_gen: v7x
topology: tpu7x:2x2x1
jax: 0.10.0
libtpu: 0.0.40
codegen_flags: <defaults>
</compile_context>

<pallas_src>
import functools
import math

import jax
import jax.numpy as jnp
from jax import lax
from jax.experimental import pallas as pl
from jax.experimental.pallas import tpu as pltpu

LN_EPS = 1e-5  # nn.LayerNorm default eps


# ----------------------------- in-kernel helpers ---------------------------- #

def _layernorm(x, gamma, beta):
    # standard nn.LayerNorm: biased variance, eps inside the sqrt (f32 VPU math)
    mean = jnp.mean(x, axis=-1, keepdims=True)
    var = jnp.mean((x - mean) ** 2, axis=-1, keepdims=True)
    return (x - mean) * lax.rsqrt(var + LN_EPS) * gamma + beta


def _silu(x):
    return x * jax.nn.sigmoid(x)


def _mha(hf, wqkv, bqkv, wo, bo, *, num_heads, head_dim, bt, seq):
    """Head-batched multi-head self-attention, fully VMEM/vreg resident.

    hf: (bt*seq, C) f32.  wqkv: (C, 3*Dt) bf16 (1/sqrt(dh) folded into Q cols),
    wo: (Dt, Dt) bf16, biases f32.  Returns (bt*seq, Dt) f32."""
    dt = num_heads * head_dim
    m = bt * seq
    # single fused QKV matmul for all batch rows (bf16 operands, f32 accum)
    qkv = jnp.dot(hf.astype(jnp.bfloat16), wqkv,
                  preferred_element_type=jnp.float32) + bqkv           # (M, 3*Dt)
    qkv3 = qkv.reshape(bt, seq, 3 * dt)

    def heads(off):
        # stack heads on a leading (major) axis: (H*bt, seq, dh), head-major
        return jnp.concatenate(
            [qkv3[:, :, off + h * head_dim: off + (h + 1) * head_dim]
             for h in range(num_heads)], axis=0).astype(jnp.bfloat16)

    q_hb, k_hb, v_hb = heads(0), heads(dt), heads(2 * dt)
    # one batched MXU pass for all heads & batch rows (scale already folded in)
    s = lax.dot_general(q_hb, k_hb, (((2,), (2,)), ((0,), (0,))),
                        preferred_element_type=jnp.float32)            # (H*bt,S,S)
    s = s - jnp.max(s, axis=-1, keepdims=True)
    p = jnp.exp(s)
    p = p * pl.reciprocal(jnp.sum(p, axis=-1, keepdims=True), approx=True)
    ctx = lax.dot_general(p.astype(jnp.bfloat16), v_hb,
                          (((2,), (1,)), ((0,), (0,))),
                          preferred_element_type=jnp.float32)           # (H*bt,S,dh)
    ctx = jnp.concatenate(
        [ctx[h * bt:(h + 1) * bt] for h in range(num_heads)], axis=-1)  # (bt,S,Dt)
    # single output-projection matmul for all rows
    return jnp.dot(ctx.reshape(m, dt).astype(jnp.bfloat16), wo,
                   preferred_element_type=jnp.float32) + bo             # (M, Dt)


# ------------------------------- fused kernel ------------------------------- #

def _trans_simple_block_kernel(num_heads, head_dim, bt, seq,
                               x_ref, emb_ref, vecd_ref, vec3d_ref,
                               wqkv_ref, wo_ref, we_ref, o_ref):
    dt = num_heads * head_dim
    m = bt * seq

    x = x_ref[...]                                    # (bt, S, C) f32
    xf = x.reshape(m, dt)                             # flatten batch into matmul M

    vec = vecd_ref[...]                               # (8, Dt) packed vector params
    g_in, b_in = vec[0:1], vec[1:2]
    g_out, b_out = vec[2:3], vec[3:4]
    bo1, bo2, be = vec[4:5], vec[5:6], vec[6:7]
    v3 = vec3d_ref[...]                               # (2, 3*Dt)
    bqkv1, bqkv2 = v3[0:1], v3[1:2]

    # ---- in_layers: LayerNorm -> SiLU -> trans_nd (MHA) ----
    h = _mha(_silu(_layernorm(xf, g_in, b_in)),
             wqkv_ref[0], bqkv1, wo_ref[0], bo1,
             num_heads=num_heads, head_dim=head_dim, bt=bt, seq=seq)    # (M, Dt)

    # ---- emb_layers: SiLU -> Linear, broadcast over the sequence ----
    e = _silu(emb_ref[...].reshape(bt, -1))                             # (bt, E)
    emb_out = jnp.dot(e.astype(jnp.bfloat16), we_ref[...],
                      preferred_element_type=jnp.float32) + be          # (bt, Dt)
    h = (h.reshape(bt, seq, dt) + emb_out.reshape(bt, 1, dt)).reshape(m, dt)

    # ---- out_layers: LayerNorm -> SiLU -> Dropout(p=0) -> trans_nd ----
    h2 = _mha(_silu(_layernorm(h, g_out, b_out)),
              wqkv_ref[1], bqkv2, wo_ref[1], bo2,
              num_heads=num_heads, head_dim=head_dim, bt=bt, seq=seq)

    # ---- skip_connection (Identity) + h, fused residual, lane-dense store ----
    o_ref[...] = x + h2.reshape(bt, seq, dt)


# --------------------------------- wrapper ---------------------------------- #

def _choose_batch_block(B, S, target_rows=128):
    """Largest batch block whose flattened rows stay near the MXU row count,
    while keeping >= 2 grid steps when possible (v7x megacore)."""
    cap = max(1, target_rows // max(S, 1))
    divs = [d for d in range(1, B + 1) if B % d == 0 and d <= cap]
    bt = max(divs) if divs else 1
    if B // bt < 2:
        two = [d for d in divs if B // d >= 2]
        if two:
            bt = max(two)
    return bt


def trans_simple_block(params, x, emb, *, num_heads, head_dim):
    B, S, C = x.shape
    E = emb.shape[1]
    Dt = num_heads * head_dim
    assert C == Dt, "covered path: out_channels == channels (Identity skip)"

    bt = _choose_batch_block(B, S)

    f32 = lambda v: jnp.asarray(v, jnp.float32)
    scale = 1.0 / math.sqrt(head_dim)

    def fold_scale(w, b):
        # fold the 1/sqrt(head_dim) softmax scale into the Q columns (static fold)
        w = f32(w).at[:, :Dt].multiply(scale)
        b = f32(b).at[:Dt].multiply(scale)
        return w, b

    wqkv1, bqkv1 = fold_scale(params["wqkv1"], params["bqkv1"])
    wqkv2, bqkv2 = fold_scale(params["wqkv2"], params["bqkv2"])

    # pack the small vector params into two resident arrays (f32 for VPU math)
    vecd = jnp.zeros((8, Dt), jnp.float32).at[:7].set(jnp.stack([
        f32(params["ln_in_g"]), f32(params["ln_in_b"]),
        f32(params["ln_out_g"]), f32(params["ln_out_b"]),
        f32(params["bo1"]), f32(params["bo2"]), f32(params["be"])]))
    vec3d = jnp.stack([bqkv1, bqkv2])                                  # (2, 3*Dt)
    # matmul weights stacked & cast to bf16 (MXU operands)
    wqkv = jnp.stack([wqkv1, wqkv2]).astype(jnp.bfloat16)              # (2, C, 3*Dt)
    wo = jnp.stack([f32(params["wo1"]),
                    f32(params["wo2"])]).astype(jnp.bfloat16)          # (2, Dt, Dt)
    we = f32(params["we"]).astype(jnp.bfloat16)                        # (E, Dt)

    consts = [vecd, vec3d, wqkv, wo, we]

    def full_spec(a):
        nd = a.ndim
        return pl.BlockSpec(a.shape, lambda bb: (0,) * nd)

    # (B, 1, E) so the emb block's last two dims equal the full array dims
    emb3 = f32(emb).reshape(B, 1, E)

    kernel = functools.partial(_trans_simple_block_kernel,
                               num_heads, head_dim, bt, S)
    # TODO(synk): for realistic C (512-1024) on v7x, single-buffer the resident
    #             weight blocks (pipeline_mode=pl.Buffered(1)) / tile the QKV
    #             matmul over K and set vmem_limit_bytes (64 MiB VMEM per TC).
    return pl.pallas_call(
        kernel,
        out_shape=jax.ShapeDtypeStruct((B, S, Dt), jnp.float32),
        grid=(B // bt,),
        in_specs=[pl.BlockSpec((bt, S, C), lambda bb: (bb, 0, 0)),   # x, per block
                  pl.BlockSpec((bt, 1, E), lambda bb: (bb, 0, 0))]   # emb, per block
                 + [full_spec(a) for a in consts],                   # resident weights
        out_specs=pl.BlockSpec((bt, S, Dt), lambda bb: (bb, 0, 0)),
        compiler_params=pltpu.CompilerParams(
            dimension_semantics=("parallel",)),   # v7x megacore; no-op on v5e/v6e
    )(f32(x), emb3, *consts)


# ------------------------- pure-JAX reference check ------------------------- #

def _ref_layernorm(x, g, b):
    mean = x.mean(-1, keepdims=True)
    var = ((x - mean) ** 2).mean(-1, keepdims=True)
    return (x - mean) / jnp.sqrt(var + LN_EPS) * g + b


def _ref_mha(h, wqkv, bqkv, wo, bo, H, dh):
    S = h.shape[0]
    Dt = H * dh
    qkv = h @ wqkv + bqkv
    q = qkv[:, :Dt].reshape(S, H, dh)
    k = qkv[:, Dt:2 * Dt].reshape(S, H, dh)
    v = qkv[:, 2 * Dt:].reshape(S, H, dh)
    s = jnp.einsum("qhd,khd->hqk", q, k) / math.sqrt(dh)
    p = jax.nn.softmax(s, axis=-1)
    ctx = jnp.einsum("hqk,khd->qhd", p, v).reshape(S, Dt)
    return ctx @ wo + bo


def _ref_block(params, x, emb, H, dh):
    def one(xb, eb):
        h = _ref_layernorm(xb, params["ln_in_g"], params["ln_in_b"])
        h = h * jax.nn.sigmoid(h)
        h = _ref_mha(h, params["wqkv1"], params["bqkv1"], params["wo1"], params["bo1"], H, dh)
        e = eb * jax.nn.sigmoid(eb)
        h = h + (e @ params["we"] + params["be"])[None, :]
        h2 = _ref_layernorm(h, params["ln_out_g"], params["ln_out_b"])
        h2 = h2 * jax.nn.sigmoid(h2)
        h2 = _ref_mha(h2, params["wqkv2"], params["bqkv2"], params["wo2"], params["bo2"], H, dh)
        return xb + h2
    return jax.vmap(one)(x, emb)


# ----------------------------------- main ------------------------------------ #

if __name__ == "__main__":
    B, S, E = 2, 8, 32                 # batch, sequence, emb_channels
    head_dim = 64                      # attention_head_size from the module
    num_heads = 2
    C = num_heads * head_dim           # channels == out_channels == 128 -> Identity skip
    Dt = C

    key = jax.random.PRNGKey(0)
    ks = jax.random.split(key, 16)
    nrm = lambda k, shp, s=0.05: s * jax.random.normal(k, shp, jnp.float32)

    params = {
        "ln_in_g": 1.0 + nrm(ks[0], (C,)), "ln_in_b": nrm(ks[1], (C,)),
        "wqkv1": nrm(ks[2], (C, 3 * Dt)), "bqkv1": nrm(ks[3], (3 * Dt,)),
        "wo1": nrm(ks[4], (Dt, Dt)), "bo1": nrm(ks[5], (Dt,)),
        "we": nrm(ks[6], (E, Dt)), "be": nrm(ks[7], (Dt,)),
        "ln_out_g": 1.0 + nrm(ks[8], (Dt,)), "ln_out_b": nrm(ks[9], (Dt,)),
        # zero_module() is an init-time detail; random weights exercise the math.
        "wqkv2": nrm(ks[10], (Dt, 3 * Dt)), "bqkv2": nrm(ks[11], (3 * Dt,)),
        "wo2": nrm(ks[12], (Dt, Dt)), "bo2": nrm(ks[13], (Dt,)),
    }

    x = jax.random.normal(ks[14], (B, S, C), jnp.float32)
    emb = jax.random.normal(ks[15], (B, E), jnp.float32)

    out = trans_simple_block(params, x, emb, num_heads=num_heads, head_dim=head_dim)
    out = jax.block_until_ready(out)

    ref = _ref_block(params, x, emb, num_heads, head_dim)
    assert out.shape == (B, S, C)
    max_diff = float(jnp.max(jnp.abs(out - ref)))
    # bf16 MXU operands + approx reciprocal -> slightly looser tolerance than f32
    assert jnp.allclose(out, ref, atol=3e-2, rtol=3e-2), f"mismatch vs reference (max {max_diff})"

    print("KERNEL_OK")
</pallas_src>

<mosaic_0001>
module attributes {stable_mosaic.version = 11 : i64} {
  func.func @_trans_simple_block_kernel(%arg0: i32, %arg1: memref<1x8x128xf32, #tpu.memory_space<vmem>>, %arg2: memref<1x1x32xf32, #tpu.memory_space<vmem>>, %arg3: memref<8x128xf32, #tpu.memory_space<vmem>>, %arg4: memref<2x384xf32, #tpu.memory_space<vmem>>, %arg5: memref<2x128x384xbf16, #tpu.memory_space<vmem>>, %arg6: memref<2x128x128xbf16, #tpu.memory_space<vmem>>, %arg7: memref<32x128xbf16, #tpu.memory_space<vmem>>, %arg8: memref<1x8x128xf32, #tpu.memory_space<vmem>>) attributes {dimension_semantics = [#tpu.dimension_semantics<parallel>], iteration_bounds = array<i64: 2>, scalar_prefetch = 0 : i64, scratch_operands = 0 : i64, tpu.core_type = #tpu.core_type<tc>, window_params = [{transform_indices = @transform_0, window_bounds = array<i64: 1, 8, 128>}, {transform_indices = @transform_1, window_bounds = array<i64: 1, 1, 32>}, {pipeline_mode = #tpu.pipeline_mode<synchronous>, transform_indices = @transform_2, window_bounds = array<i64: 8, 128>}, {pipeline_mode = #tpu.pipeline_mode<synchronous>, transform_indices = @transform_3, window_bounds = array<i64: 2, 384>}, {pipeline_mode = #tpu.pipeline_mode<synchronous>, transform_indices = @transform_4, window_bounds = array<i64: 2, 128, 384>}, {pipeline_mode = #tpu.pipeline_mode<synchronous>, transform_indices = @transform_5, window_bounds = array<i64: 2, 128, 128>}, {pipeline_mode = #tpu.pipeline_mode<synchronous>, transform_indices = @transform_6, window_bounds = array<i64: 32, 128>}, {transform_indices = @transform_7, window_bounds = array<i64: 1, 8, 128>}]} {
    %c0 = arith.constant 0 : index
    %c0_0 = arith.constant 0 : index
    %c0_1 = arith.constant 0 : index
    %0 = vector.load %arg1[%c0, %c0_0, %c0_1] : memref<1x8x128xf32, #tpu.memory_space<vmem>>, vector<1x8x128xf32>
    %1 = vector.shape_cast %0 : vector<1x8x128xf32> to vector<8x128xf32>
    %c0_2 = arith.constant 0 : index
    %c0_3 = arith.constant 0 : index
    %2 = vector.load %arg3[%c0_2, %c0_3] : memref<8x128xf32, #tpu.memory_space<vmem>>, vector<8x128xf32>
    %3 = vector.extract_strided_slice %2 {offsets = [0, 0], sizes = [1, 128], strides = [1, 1]} : vector<8x128xf32> to vector<1x128xf32>
    %4 = vector.extract_strided_slice %2 {offsets = [1, 0], sizes = [1, 128], strides = [1, 1]} : vector<8x128xf32> to vector<1x128xf32>
    %5 = vector.extract_strided_slice %2 {offsets = [2, 0], sizes = [1, 128], strides = [1, 1]} : vector<8x128xf32> to vector<1x128xf32>
    %6 = vector.extract_strided_slice %2 {offsets = [3, 0], sizes = [1, 128], strides = [1, 1]} : vector<8x128xf32> to vector<1x128xf32>
    %7 = vector.extract_strided_slice %2 {offsets = [4, 0], sizes = [1, 128], strides = [1, 1]} : vector<8x128xf32> to vector<1x128xf32>
    %8 = vector.extract_strided_slice %2 {offsets = [5, 0], sizes = [1, 128], strides = [1, 1]} : vector<8x128xf32> to vector<1x128xf32>
    %9 = vector.extract_strided_slice %2 {offsets = [6, 0], sizes = [1, 128], strides = [1, 1]} : vector<8x128xf32> to vector<1x128xf32>
    %c0_4 = arith.constant 0 : index
    %c0_5 = arith.constant 0 : index
    %10 = vector.load %arg4[%c0_4, %c0_5] : memref<2x384xf32, #tpu.memory_space<vmem>>, vector<2x384xf32>
    %11 = vector.extract_strided_slice %10 {offsets = [0, 0], sizes = [1, 384], strides = [1, 1]} : vector<2x384xf32> to vector<1x384xf32>
    %12 = vector.extract_strided_slice %10 {offsets = [1, 0], sizes = [1, 384], strides = [1, 1]} : vector<2x384xf32> to vector<1x384xf32>
    %cst = arith.constant dense<0.000000e+00> : vector<8xf32>
    %13 = vector.multi_reduction <add>, %1, %cst [1] : vector<8x128xf32> to vector<8xf32>
    %14 = vector.shape_cast %13 : vector<8xf32> to vector<8x1xf32>
    %cst_6 = arith.constant 1.280000e+02 : f32
    %15 = vector.broadcast %cst_6 : f32 to vector<8x1xf32>
    %16 = arith.divf %14, %15 : vector<8x1xf32>
    %17 = vector.broadcast %16 : vector<8x1xf32> to vector<8x128xf32>
    %18 = arith.subf %1, %17 : vector<8x128xf32>
    %19 = arith.mulf %18, %18 : vector<8x128xf32>
    %cst_7 = arith.constant dense<0.000000e+00> : vector<8xf32>
    %20 = vector.multi_reduction <add>, %19, %cst_7 [1] : vector<8x128xf32> to vector<8xf32>
    %21 = vector.shape_cast %20 : vector<8xf32> to vector<8x1xf32>
    %cst_8 = arith.constant 1.280000e+02 : f32
    %22 = vector.broadcast %cst_8 : f32 to vector<8x1xf32>
    %23 = arith.divf %21, %22 : vector<8x1xf32>
    %24 = vector.broadcast %16 : vector<8x1xf32> to vector<8x128xf32>
    %25 = arith.subf %1, %24 : vector<8x128xf32>
    %cst_9 = arith.constant 9.99999974E-6 : f32
    %26 = vector.broadcast %cst_9 : f32 to vector<8x1xf32>
    %27 = arith.addf %23, %26 : vector<8x1xf32>
    %28 = math.rsqrt %27 : vector<8x1xf32>
    %29 = vector.broadcast %28 : vector<8x1xf32> to vector<8x128xf32>
    %30 = arith.mulf %25, %29 : vector<8x128xf32>
    %31 = vector.broadcast %3 : vector<1x128xf32> to vector<8x128xf32>
    %32 = arith.mulf %30, %31 : vector<8x128xf32>
    %33 = vector.broadcast %4 : vector<1x128xf32> to vector<8x128xf32>
    %34 = arith.addf %32, %33 : vector<8x128xf32>
    %35 = arith.negf %34 : vector<8x128xf32>
    %36 = math.exp %35 : vector<8x128xf32>
    %cst_10 = arith.constant 1.000000e+00 : f32
    %37 = vector.broadcast %cst_10 : f32 to vector<8x128xf32>
    %38 = arith.addf %37, %36 : vector<8x128xf32>
    %39 = arith.divf %37, %38 : vector<8x128xf32>
    %40 = arith.mulf %34, %39 : vector<8x128xf32>
    %c0_11 = arith.constant 0 : index
    %c0_12 = arith.constant 0 : index
    %c0_13 = arith.constant 0 : index
    %41 = vector.load %arg5[%c0_11, %c0_12, %c0_13] : memref<2x128x384xbf16, #tpu.memory_space<vmem>>, vector<1x128x384xbf16>
    %42 = vector.shape_cast %41 : vector<1x128x384xbf16> to vector<128x384xbf16>
    %c0_14 = arith.constant 0 : index
    %c0_15 = arith.constant 0 : index
    %c0_16 = arith.constant 0 : index
    %43 = vector.load %arg6[%c0_14, %c0_15, %c0_16] : memref<2x128x128xbf16, #tpu.memory_space<vmem>>, vector<1x128x128xbf16>
    %44 = vector.shape_cast %43 : vector<1x128x128xbf16> to vector<128x128xbf16>
    %45 = arith.truncf %40 : vector<8x128xf32> to vector<8x128xbf16>
    %cst_17 = arith.constant dense<0.000000e+00> : vector<8x384xf32>
    %46 = tpu.matmul %45, %42, %cst_17 {dimension_numbers = #tpu.dot_dimension_numbers<[1], [0], [0], [1], [0, 0, 1, 1], [], []>} : vector<8x128xbf16>, vector<128x384xbf16>, vector<8x384xf32> -> vector<8x384xf32>
    %47 = vector.broadcast %11 : vector<1x384xf32> to vector<8x384xf32>
    %48 = arith.addf %46, %47 : vector<8x384xf32>
    %49 = vector.shape_cast %48 : vector<8x384xf32> to vector<1x8x384xf32>
    %50 = vector.extract_strided_slice %49 {offsets = [0, 0, 0], sizes = [1, 8, 64], strides = [1, 1, 1]} : vector<1x8x384xf32> to vector<1x8x64xf32>
    %51 = vector.extract_strided_slice %49 {offsets = [0, 0, 64], sizes = [1, 8, 64], strides = [1, 1, 1]} : vector<1x8x384xf32> to vector<1x8x64xf32>
    %52 = tpu.concatenate %50, %51 in 0 : vector<1x8x64xf32>, vector<1x8x64xf32> -> vector<2x8x64xf32>
    %53 = arith.truncf %52 : vector<2x8x64xf32> to vector<2x8x64xbf16>
    %54 = vector.extract_strided_slice %49 {offsets = [0, 0, 128], sizes = [1, 8, 64], strides = [1, 1, 1]} : vector<1x8x384xf32> to vector<1x8x64xf32>
    %55 = vector.extract_strided_slice %49 {offsets = [0, 0, 192], sizes = [1, 8, 64], strides = [1, 1, 1]} : vector<1x8x384xf32> to vector<1x8x64xf32>
    %56 = tpu.concatenate %54, %55 in 0 : vector<1x8x64xf32>, vector<1x8x64xf32> -> vector<2x8x64xf32>
    %57 = arith.truncf %56 : vector<2x8x64xf32> to vector<2x8x64xbf16>
    %58 = vector.extract_strided_slice %49 {offsets = [0, 0, 256], sizes = [1, 8, 64], strides = [1, 1, 1]} : vector<1x8x384xf32> to vector<1x8x64xf32>
    %59 = vector.extract_strided_slice %49 {offsets = [0, 0, 320], sizes = [1, 8, 64], strides = [1, 1, 1]} : vector<1x8x384xf32> to vector<1x8x64xf32>
    %60 = tpu.concatenate %58, %59 in 0 : vector<1x8x64xf32>, vector<1x8x64xf32> -> vector<2x8x64xf32>
    %61 = arith.truncf %60 : vector<2x8x64xf32> to vector<2x8x64xbf16>
    %cst_18 = arith.constant dense<0.000000e+00> : vector<2x8x8xf32>
    %62 = tpu.matmul %53, %57, %cst_18 {dimension_numbers = #tpu.dot_dimension_numbers<[2], [2], [1], [1], [0, 0, 0, 1, 1, 1], [0], [0]>} : vector<2x8x64xbf16>, vector<2x8x64xbf16>, vector<2x8x8xf32> -> vector<2x8x8xf32>
    %cst_19 = arith.constant dense<0xFF800000> : vector<2x8xf32>
    %63 = vector.multi_reduction <maximumf>, %62, %cst_19 [2] : vector<2x8x8xf32> to vector<2x8xf32>
    %64 = vector.shape_cast %63 : vector<2x8xf32> to vector<2x8x1xf32>
    %65 = vector.broadcast %64 : vector<2x8x1xf32> to vector<2x8x8xf32>
    %66 = arith.subf %62, %65 : vector<2x8x8xf32>
    %67 = math.exp %66 : vector<2x8x8xf32>
    %cst_20 = arith.constant dense<0.000000e+00> : vector<2x8xf32>
    %68 = vector.multi_reduction <add>, %67, %cst_20 [2] : vector<2x8x8xf32> to vector<2x8xf32>
    %69 = vector.shape_cast %68 : vector<2x8xf32> to vector<2x8x1xf32>
    %70 = tpu.reciprocal %69 {approx = true} : vector<2x8x1xf32> -> vector<2x8x1xf32>
    %71 = vector.broadcast %70 : vector<2x8x1xf32> to vector<2x8x8xf32>
    %72 = arith.mulf %67, %71 : vector<2x8x8xf32>
    %73 = arith.truncf %72 : vector<2x8x8xf32> to vector<2x8x8xbf16>
    %cst_21 = arith.constant dense<0.000000e+00> : vector<2x8x64xf32>
    %74 = tpu.matmul %73, %61, %cst_21 {dimension_numbers = #tpu.dot_dimension_numbers<[2], [1], [1], [2], [0, 0, 0, 1, 1, 2], [0], [0]>} : vector<2x8x8xbf16>, vector<2x8x64xbf16>, vector<2x8x64xf32> -> vector<2x8x64xf32>
    %75 = vector.extract_strided_slice %74 {offsets = [0, 0, 0], sizes = [1, 8, 64], strides = [1, 1, 1]} : vector<2x8x64xf32> to vector<1x8x64xf32>
    %76 = vector.extract_strided_slice %74 {offsets = [1, 0, 0], sizes = [1, 8, 64], strides = [1, 1, 1]} : vector<2x8x64xf32> to vector<1x8x64xf32>
    %77 = tpu.concatenate %75, %76 in 2 : vector<1x8x64xf32>, vector<1x8x64xf32> -> vector<1x8x128xf32>
    %78 = vector.shape_cast %77 : vector<1x8x128xf32> to vector<8x128xf32>
    %79 = arith.truncf %78 : vector<8x128xf32> to vector<8x128xbf16>
    %cst_22 = arith.constant dense<0.000000e+00> : vector<8x128xf32>
    %80 = tpu.matmul %79, %44, %cst_22 {dimension_numbers = #tpu.dot_dimension_numbers<[1], [0], [0], [1], [0, 0, 1, 1], [], []>} : vector<8x128xbf16>, vector<128x128xbf16>, vector<8x128xf32> -> vector<8x128xf32>
    %81 = vector.broadcast %7 : vector<1x128xf32> to vector<8x128xf32>
    %82 = arith.addf %80, %81 : vector<8x128xf32>
    %c0_23 = arith.constant 0 : index
    %c0_24 = arith.constant 0 : index
    %c0_25 = arith.constant 0 : index
    %83 = vector.load %arg2[%c0_23, %c0_24, %c0_25] : memref<1x1x32xf32, #tpu.memory_space<vmem>>, vector<1x1x32xf32>
    %84 = vector.shape_cast %83 : vector<1x1x32xf32> to vector<1x32xf32>
    %85 = arith.negf %84 : vector<1x32xf32>
    %86 = math.exp %85 : vector<1x32xf32>
    %cst_26 = arith.constant 1.000000e+00 : f32
    %87 = vector.broadcast %cst_26 : f32 to vector<1x32xf32>
    %88 = arith.addf %87, %86 : vector<1x32xf32>
    %89 = arith.divf %87, %88 : vector<1x32xf32>
    %90 = arith.mulf %84, %89 : vector<1x32xf32>
    %91 = arith.truncf %90 : vector<1x32xf32> to vector<1x32xbf16>
    %c0_27 = arith.constant 0 : index
    %c0_28 = arith.constant 0 : index
    %92 = vector.load %arg7[%c0_27, %c0_28] : memref<32x128xbf16, #tpu.memory_space<vmem>>, vector<32x128xbf16>
    %cst_29 = arith.constant dense<0.000000e+00> : vector<1x128xf32>
    %93 = tpu.matmul %91, %92, %cst_29 {dimension_numbers = #tpu.dot_dimension_numbers<[1], [0], [0], [1], [0, 0, 1, 1], [], []>} : vector<1x32xbf16>, vector<32x128xbf16>, vector<1x128xf32> -> vector<1x128xf32>
    %94 = arith.addf %93, %9 : vector<1x128xf32>
    %95 = vector.shape_cast %82 : vector<8x128xf32> to vector<1x8x128xf32>
    %96 = vector.shape_cast %94 : vector<1x128xf32> to vector<1x1x128xf32>
    %97 = vector.broadcast %96 : vector<1x1x128xf32> to vector<1x8x128xf32>
    %98 = arith.addf %95, %97 : vector<1x8x128xf32>
    %99 = vector.shape_cast %98 : vector<1x8x128xf32> to vector<8x128xf32>
    %cst_30 = arith.constant dense<0.000000e+00> : vector<8xf32>
    %100 = vector.multi_reduction <add>, %99, %cst_30 [1] : vector<8x128xf32> to vector<8xf32>
    %101 = vector.shape_cast %100 : vector<8xf32> to vector<8x1xf32>
    %cst_31 = arith.constant 1.280000e+02 : f32
    %102 = vector.broadcast %cst_31 : f32 to vector<8x1xf32>
    %103 = arith.divf %101, %102 : vector<8x1xf32>
    %104 = vector.broadcast %103 : vector<8x1xf32> to vector<8x128xf32>
    %105 = arith.subf %99, %104 : vector<8x128xf32>
    %106 = arith.mulf %105, %105 : vector<8x128xf32>
    %cst_32 = arith.constant dense<0.000000e+00> : vector<8xf32>
    %107 = vector.multi_reduction <add>, %106, %cst_32 [1] : vector<8x128xf32> to vector<8xf32>
    %108 = vector.shape_cast %107 : vector<8xf32> to vector<8x1xf32>
    %cst_33 = arith.constant 1.280000e+02 : f32
    %109 = vector.broadcast %cst_33 : f32 to vector<8x1xf32>
    %110 = arith.divf %108, %109 : vector<8x1xf32>
    %111 = vector.broadcast %103 : vector<8x1xf32> to vector<8x128xf32>
    %112 = arith.subf %99, %111 : vector<8x128xf32>
    %cst_34 = arith.constant 9.99999974E-6 : f32
    %113 = vector.broadcast %cst_34 : f32 to vector<8x1xf32>
    %114 = arith.addf %110, %113 : vector<8x1xf32>
    %115 = math.rsqrt %114 : vector<8x1xf32>
    %116 = vector.broadcast %115 : vector<8x1xf32> to vector<8x128xf32>
    %117 = arith.mulf %112, %116 : vector<8x128xf32>
    %118 = vector.broadcast %5 : vector<1x128xf32> to vector<8x128xf32>
    %119 = arith.mulf %117, %118 : vector<8x128xf32>
    %120 = vector.broadcast %6 : vector<1x128xf32> to vector<8x128xf32>
    %121 = arith.addf %119, %120 : vector<8x128xf32>
    %122 = arith.negf %121 : vector<8x128xf32>
    %123 = math.exp %122 : vector<8x128xf32>
    %cst_35 = arith.constant 1.000000e+00 : f32
    %124 = vector.broadcast %cst_35 : f32 to vector<8x128xf32>
    %125 = arith.addf %124, %123 : vector<8x128xf32>
    %126 = arith.divf %124, %125 : vector<8x128xf32>
    %127 = arith.mulf %121, %126 : vector<8x128xf32>
    %c1 = arith.constant 1 : index
    %c0_36 = arith.constant 0 : index
    %c0_37 = arith.constant 0 : index
    %128 = vector.load %arg5[%c1, %c0_36, %c0_37] : memref<2x128x384xbf16, #tpu.memory_space<vmem>>, vector<1x128x384xbf16>
    %129 = vector.shape_cast %128 : vector<1x128x384xbf16> to vector<128x384xbf16>
    %c1_38 = arith.constant 1 : index
    %c0_39 = arith.constant 0 : index
    %c0_40 = arith.constant 0 : index
    %130 = vector.load %arg6[%c1_38, %c0_39, %c0_40] : memref<2x128x128xbf16, #tpu.memory_space<vmem>>, vector<1x128x128xbf16>
    %131 = vector.shape_cast %130 : vector<1x128x128xbf16> to vector<128x128xbf16>
    %132 = arith.truncf %127 : vector<8x128xf32> to vector<8x128xbf16>
    %cst_41 = arith.constant dense<0.000000e+00> : vector<8x384xf32>
    %133 = tpu.matmul %132, %129, %cst_41 {dimension_numbers = #tpu.dot_dimension_numbers<[1], [0], [0], [1], [0, 0, 1, 1], [], []>} : vector<8x128xbf16>, vector<128x384xbf16>, vector<8x384xf32> -> vector<8x384xf32>
    %134 = vector.broadcast %12 : vector<1x384xf32> to vector<8x384xf32>
    %135 = arith.addf %133, %134 : vector<8x384xf32>
    %136 = vector.shape_cast %135 : vector<8x384xf32> to vector<1x8x384xf32>
    %137 = vector.extract_strided_slice %136 {offsets = [0, 0, 0], sizes = [1, 8, 64], strides = [1, 1, 1]} : vector<1x8x384xf32> to vector<1x8x64xf32>
    %138 = vector.extract_strided_slice %136 {offsets = [0, 0, 64], sizes = [1, 8, 64], strides = [1, 1, 1]} : vector<1x8x384xf32> to vector<1x8x64xf32>
    %139 = tpu.concatenate %137, %138 in 0 : vector<1x8x64xf32>, vector<1x8x64xf32> -> vector<2x8x64xf32>
    %140 = arith.truncf %139 : vector<2x8x64xf32> to vector<2x8x64xbf16>
    %141 = vector.extract_strided_slice %136 {offsets = [0, 0, 128], sizes = [1, 8, 64], strides = [1, 1, 1]} : vector<1x8x384xf32> to vector<1x8x64xf32>
    %142 = vector.extract_strided_slice %136 {offsets = [0, 0, 192], sizes = [1, 8, 64], strides = [1, 1, 1]} : vector<1x8x384xf32> to vector<1x8x64xf32>
    %143 = tpu.concatenate %141, %142 in 0 : vector<1x8x64xf32>, vector<1x8x64xf32> -> vector<2x8x64xf32>
    %144 = arith.truncf %143 : vector<2x8x64xf32> to vector<2x8x64xbf16>
    %145 = vector.extract_strided_slice %136 {offsets = [0, 0, 256], sizes = [1, 8, 64], strides = [1, 1, 1]} : vector<1x8x384xf32> to vector<1x8x64xf32>
    %146 = vector.extract_strided_slice %136 {offsets = [0, 0, 320], sizes = [1, 8, 64], strides = [1, 1, 1]} : vector<1x8x384xf32> to vector<1x8x64xf32>
    %147 = tpu.concatenate %145, %146 in 0 : vector<1x8x64xf32>, vector<1x8x64xf32> -> vector<2x8x64xf32>
    %148 = arith.truncf %147 : vector<2x8x64xf32> to vector<2x8x64xbf16>
    %cst_42 = arith.constant dense<0.000000e+00> : vector<2x8x8xf32>
    %149 = tpu.matmul %140, %144, %cst_42 {dimension_numbers = #tpu.dot_dimension_numbers<[2], [2], [1], [1], [0, 0, 0, 1, 1, 1], [0], [0]>} : vector<2x8x64xbf16>, vector<2x8x64xbf16>, vector<2x8x8xf32> -> vector<2x8x8xf32>
    %cst_43 = arith.constant dense<0xFF800000> : vector<2x8xf32>
    %150 = vector.multi_reduction <maximumf>, %149, %cst_43 [2] : vector<2x8x8xf32> to vector<2x8xf32>
    %151 = vector.shape_cast %150 : vector<2x8xf32> to vector<2x8x1xf32>
    %152 = vector.broadcast %151 : vector<2x8x1xf32> to vector<2x8x8xf32>
    %153 = arith.subf %149, %152 : vector<2x8x8xf32>
    %154 = math.exp %153 : vector<2x8x8xf32>
    %cst_44 = arith.constant dense<0.000000e+00> : vector<2x8xf32>
    %155 = vector.multi_reduction <add>, %154, %cst_44 [2] : vector<2x8x8xf32> to vector<2x8xf32>
    %156 = vector.shape_cast %155 : vector<2x8xf32> to vector<2x8x1xf32>
    %157 = tpu.reciprocal %156 {approx = true} : vector<2x8x1xf32> -> vector<2x8x1xf32>
    %158 = vector.broadcast %157 : vector<2x8x1xf32> to vector<2x8x8xf32>
    %159 = arith.mulf %154, %158 : vector<2x8x8xf32>
    %160 = arith.truncf %159 : vector<2x8x8xf32> to vector<2x8x8xbf16>
    %cst_45 = arith.constant dense<0.000000e+00> : vector<2x8x64xf32>
    %161 = tpu.matmul %160, %148, %cst_45 {dimension_numbers = #tpu.dot_dimension_numbers<[2], [1], [1], [2], [0, 0, 0, 1, 1, 2], [0], [0]>} : vector<2x8x8xbf16>, vector<2x8x64xbf16>, vector<2x8x64xf32> -> vector<2x8x64xf32>
    %162 = vector.extract_strided_slice %161 {offsets = [0, 0, 0], sizes = [1, 8, 64], strides = [1, 1, 1]} : vector<2x8x64xf32> to vector<1x8x64xf32>
    %163 = vector.extract_strided_slice %161 {offsets = [1, 0, 0], sizes = [1, 8, 64], strides = [1, 1, 1]} : vector<2x8x64xf32> to vector<1x8x64xf32>
    %164 = tpu.concatenate %162, %163 in 2 : vector<1x8x64xf32>, vector<1x8x64xf32> -> vector<1x8x128xf32>
    %165 = vector.shape_cast %164 : vector<1x8x128xf32> to vector<8x128xf32>
    %166 = arith.truncf %165 : vector<8x128xf32> to vector<8x128xbf16>
    %cst_46 = arith.constant dense<0.000000e+00> : vector<8x128xf32>
    %167 = tpu.matmul %166, %131, %cst_46 {dimension_numbers = #tpu.dot_dimension_numbers<[1], [0], [0], [1], [0, 0, 1, 1], [], []>} : vector<8x128xbf16>, vector<128x128xbf16>, vector<8x128xf32> -> vector<8x128xf32>
    %168 = vector.broadcast %8 : vector<1x128xf32> to vector<8x128xf32>
    %169 = arith.addf %167, %168 : vector<8x128xf32>
    %170 = vector.shape_cast %169 : vector<8x128xf32> to vector<1x8x128xf32>
    %171 = arith.addf %0, %170 : vector<1x8x128xf32>
    %c0_47 = arith.constant 0 : index
    %c0_48 = arith.constant 0 : index
    %c0_49 = arith.constant 0 : index
    %172 = vector.load %arg8[%c0_47, %c0_48, %c0_49] : memref<1x8x128xf32, #tpu.memory_space<vmem>>, vector<1x8x128xf32>
    tpu.vector_store %arg8[%c0_47, %c0_48, %c0_49], %171 {strides = array<i32>} : memref<1x8x128xf32, #tpu.memory_space<vmem>>, vector<1x8x128xf32>,
    return
  }
  func.func @transform_0(%arg0: i32) -> (i32, i32, i32) {
    %c0_i32 = arith.constant 0 : i32
    %c0_i32_0 = arith.constant 0 : i32
    %c0_i32_1 = arith.constant 0 : i32
    return %arg0, %c0_i32, %c0_i32_0 : i32, i32, i32
  }
  func.func @transform_1(%arg0: i32) -> (i32, i32, i32) {
    %c0_i32 = arith.constant 0 : i32
    %c0_i32_0 = arith.constant 0 : i32
    %c0_i32_1 = arith.constant 0 : i32
    return %arg0, %c0_i32, %c0_i32_0 : i32, i32, i32
  }
  func.func @transform_2(%arg0: i32) -> (i32, i32) {
    %c0_i32 = arith.constant 0 : i32
    %c0_i32_0 = arith.constant 0 : i32
    %c0_i32_1 = arith.constant 0 : i32
    return %c0_i32, %c0_i32_0 : i32, i32
  }
  func.func @transform_3(%arg0: i32) -> (i32, i32) {
    %c0_i32 = arith.constant 0 : i32
    %c0_i32_0 = arith.constant 0 : i32
    %c0_i32_1 = arith.constant 0 : i32
    return %c0_i32, %c0_i32_0 : i32, i32
  }
  func.func @transform_4(%arg0: i32) -> (i32, i32, i32) {
    %c0_i32 = arith.constant 0 : i32
    %c0_i32_0 = arith.constant 0 : i32
    %c0_i32_1 = arith.constant 0 : i32
    %c0_i32_2 = arith.constant 0 : i32
    return %c0_i32, %c0_i32_0, %c0_i32_1 : i32, i32, i32
  }
  func.func @transform_5(%arg0: i32) -> (i32, i32, i32) {
    %c0_i32 = arith.constant 0 : i32
    %c0_i32_0 = arith.constant 0 : i32
    %c0_i32_1 = arith.constant 0 : i32
    %c0_i32_2 = arith.constant 0 : i32
    return %c0_i32, %c0_i32_0, %c0_i32_1 : i32, i32, i32
  }
  func.func @transform_6(%arg0: i32) -> (i32, i32) {
    %c0_i32 = arith.constant 0 : i32
    %c0_i32_0 = arith.constant 0 : i32
    %c0_i32_1 = arith.constant 0 : i32
    return %c0_i32, %c0_i32_0 : i32, i32
  }
  func.func @transform_7(%arg0: i32) -> (i32, i32, i32) {
    %c0_i32 = arith.constant 0 : i32
    %c0_i32_0 = arith.constant 0 : i32
    %c0_i32_1 = arith.constant 0 : i32
    return %arg0, %c0_i32, %c0_i32_0 : i32, i32, i32
  }
}

</mosaic_0001>

<bundles_post_ra>
// kernel: tpu_custom_call.1
= control target key start
LH: loop header
LB: loop body
LE: loop exit
PB: predicated region body
PF: predicated region fallthrough
CT: control target
= control target key end

     0   :  { %s3107_s0 = inlined_call_operand.hbm [shape: f32[2,8,128], index: 0, kind: input, shape index: {}]   ;;  %s3108_s1 = inlined_call_operand.hbm [shape: f32[2,1,32], index: 1, kind: input, shape index: {}]   ;;  %s3109_s2 = inlined_call_operand.hbm [shape: f32[8,128], index: 2, kind: input, shape index: {}]   ;;  %s3110_s3 = inlined_call_operand.vmem [shape: f32[2,384], index: 3, kind: input, shape index: {}]   ;;  %s3111_s4 = inlined_call_operand.hbm [shape: bf16[2,128,384], index: 4, kind: input, shape index: {}]   ;;  %s3112_s5 = inlined_call_operand.hbm [shape: bf16[2,128,128], index: 5, kind: input, shape index: {}]   ;;  %s3113_s6 = inlined_call_operand.vmem [shape: bf16[32,128], index: 6, kind: input, shape index: {}]   ;;  %s3114_s7 = inlined_call_operand.hbm [shape: f32[2,8,128], index: 7, kind: output, shape index: {}]  }
   0x1   :  { %3119 = sst [smem:[#allocation17_spill]] %s3107_s0 }
   0x2   :  { %3120 = sst [smem:[#allocation18_spill]] %s3109_s2 }
   0x3   :  { %12 = vsyncpa [#allocation3], 0 }
   0x4   :  { %14 = vsyncpa [#allocation3 + $0x1], 0 }
   0x5   :  { %15 = vsyncpa [#allocation6], 0 }
   0x6   :  { %17 = vsyncpa [#allocation6 + $0x1], 0 }
   0x7   :  { %18 = vsyncpa [#allocation9], 0 }
   0x8   :  { %19 = vsyncpa [#allocation4], 0 }
   0x9   :  { %21 = vsyncpa [#allocation4 + $0x1], 0  ;;  %s2636_s24 = smov 0   ;;  %s2638_s25 = smov 0  }
   0xa   :  { %s2640_s26 = smov 0   ;;  %s2642_s27 = smov 0  }
   0xb LB: > { %s2657_s28 = sadd.s32 4294967295, %s2580_s27   ;;  %s1865_s29 = sadd.s32 4294967294, %s2580_s27   ;;  %s2580_s27 = sphi %s2642_s27, %s3144_s27   ;;  %s2576_s26 = sphi %s2640_s26, %s3143_s26   ;;  %s2572_s25 = sphi %s2638_s25, %s3142_s25   ;;  %s2568_s24 = sphi %s2636_s24, %s3141_s24  }
   0xc   : > { %p47_p0 = scmp.ne.s32.totalorder %s2572_s25, %s2568_s24  ;;  %p3115_p1 = scmp.eq.s32.totalorder %s2657_s28, 0 }
   0xd   : > { %p208_p3 = scmp.eq.s32.totalorder %s1865_s29, 1  ;;  %p1866_p5 = scmp.ge.s32.totalorder %s2580_s27, 1 }
   0xe   : > { %p2666_p4 = por %p3115_p1, %p47_p0  ;;  %p215_p7 = scmp.lt.s32.totalorder %s2580_s27, 3 }
   0xf   : > { %p2671_p6 = por %p208_p3, %p47_p0  ;;  %s2582_s10 = smov [#allocation7]  }
  0x10   : > { %s3121_s30 = scalar_select %p2666_p4, 1, 0 }
  0x11   : > { %s3122_s8 = scalar_select %p2671_p6, 1, 0 }
  0x12   : > { %p2676_p8 = pnand %p1866_p5, %p215_p7  ;;  %s228_s11 = sshll.u32 %s2582_s10, 4  ;;  %s229_s11 = int_to_ptr.vmem [resolvable:$true] %s228_s11 }
  0x13   : > { %s2583_s12 = smov [#allocation8]   ;;  %s2584_s15 = smov [#allocation10]  }
  0x14   : > { %s3123_s9 = scalar_select %p2676_p8, 1, 0 }
  0x15   : > { %p2171_p10 = pneg %p2676_p8  ;;  %s241_s13 = sshll.u32 %s2583_s12, 4  ;;  %s2689_s13 = int_to_ptr.vmem [resolvable:$true] %s241_s13 }
  0x16   : > { %s2691_s16 = sshll.u32 %s2584_s15, 4  ;;  %s3125_s2 = sld [smem:[#allocation18_spill]]  ;;  %s255_s16 = int_to_ptr.vmem [resolvable:$true] %s2691_s16 }
  0x17   : > { %p2685_p11 = pnand %p2171_p10, %p3115_p1 }
  0x19   : > { %p2701_p13 = pneg %p2685_p11 }
  0x1c   : > { %s2358_s19 = scalar_lea.hbm %s3125_s2, 128 }
  0x1d   : > { %p2359_p12 = scmp.ne.s32.totalorder %s3125_s2, %s2358_s19  ;;  %p2365_p5 = scmp.lt.u32.totalorder %s2358_s19, %s3125_s2 }
  0x1f   : > { %p2361_p0 = pnand %p2701_p13, %p2359_p12 }
  0x21   : > { %p2362_p3 = pneg %p2361_p0 }
  0x23   : > { %p2367_p7 = pnand %p2365_p5, %p2362_p3 }
  0x25   : > { %2370 = shalt.err (!%p2367_p7)
}
  0x26   : > { %s2371_s10 = scalar_lea.vmem %s229_s11, 128  ;;  %p2379_p2 = scmp.lt.s32.totalorder %s229_s11, %s229_s11 }
  0x27   : > { %p2372_p10 = scmp.ne.s32.totalorder %s229_s11, %s2371_s10  ;;  %p2380_p6 = scmp.lt.s32.totalorder %s2371_s10, %s2371_s10 }
  0x29   : > { %p2374_p9 = pnand %p2372_p10, %p2701_p13  ;;  %p2381_p4 = por %p2380_p6, %p2379_p2 }
  0x2b   : > { %p2375_p1 = pneg %p2374_p9 }
  0x2d   : > { %p2382_p8 = pnand %p2381_p4, %p2375_p1 }
  0x2f   : > { %2385 = shalt.err (!%p2382_p8)
}
  0x30   : > { %2174 = dma.hbm_to_vmem [thread:$0]  (!%p2685_p11), %s3125_s2, 128, %s229_s11, [#allocation6]  }
  0x31   : > { %s2386_s19 = scalar_lea.hbm %s3111_s4, 6144 }
  0x32   : > { %p2387_p9 = scmp.ne.s32.totalorder %s3111_s4, %s2386_s19  ;;  %p2393_p1 = scmp.lt.u32.totalorder %s2386_s19, %s3111_s4 }
  0x34   : > { %p2389_p12 = pnand %p2387_p9, %p2701_p13 }
  0x36   : > { %p2390_p2 = pneg %p2389_p12 }
  0x38   : > { %p2395_p4 = pnand %p2393_p1, %p2390_p2 }
  0x3a   : > { %2398 = shalt.err (!%p2395_p4)
}
  0x3b   : > { %s2399_s11 = scalar_lea.vmem %s2689_s13, 6144  ;;  %p2407_p3 = scmp.lt.s32.totalorder %s2689_s13, %s2689_s13 }
  0x3c   : > { %p2400_p6 = scmp.ne.s32.totalorder %s2689_s13, %s2399_s11  ;;  %p2408_p5 = scmp.lt.s32.totalorder %s2399_s11, %s2399_s11 }
  0x3e   : > { %p2402_p8 = pnand %p2400_p6, %p2701_p13  ;;  %p2409_p7 = por %p2408_p5, %p2407_p3 }
  0x40   : > { %p2403_p0 = pneg %p2402_p8 }
  0x42   : > { %p2410_p10 = pnand %p2409_p7, %p2403_p0 }
  0x44   : > { %2413 = shalt.err (!%p2410_p10)
}
  0x45   : > { %s2585_s10 = smov 192   ;;  %s2586_s12 = smov 12  }
  0x46   : > { %2177 = dma.hbm_to_vmem [thread:$0]  (!%p2685_p11), %s3111_s4, 6144, %s2689_s13, [#allocation9], %s2585_s10, %s2585_s10, %s2586_s12  }
  0x47   : > { %s2414_s20 = scalar_lea.hbm %s3112_s5, 2048 }
  0x48   : > { %p2415_p9 = scmp.ne.s32.totalorder %s3112_s5, %s2414_s20  ;;  %p2421_p1 = scmp.lt.u32.totalorder %s2414_s20, %s3112_s5 }
  0x4a   : > { %p2417_p12 = pnand %p2415_p9, %p2701_p13 }
  0x4c   : > { %p2418_p2 = pneg %p2417_p12 }
  0x4e   : > { %p2423_p4 = pnand %p2421_p1, %p2418_p2 }
  0x50   : > { %2426 = shalt.err (!%p2423_p4)
}
  0x51   : > { %s2427_s15 = scalar_lea.vmem %s255_s16, 2048  ;;  %p2435_p3 = scmp.lt.s32.totalorder %s255_s16, %s255_s16 }
  0x52   : > { %p2428_p6 = scmp.ne.s32.totalorder %s255_s16, %s2427_s15  ;;  %p2436_p5 = scmp.lt.s32.totalorder %s2427_s15, %s2427_s15 }
  0x54   : > { %p2430_p8 = pnand %p2428_p6, %p2701_p13  ;;  %p2437_p7 = por %p2436_p5, %p2435_p3 }
  0x56   : > { %p2431_p0 = pneg %p2430_p8 }
  0x58   : > { %p2438_p10 = pnand %p2437_p7, %p2431_p0 }
  0x5a   : > { %2441 = shalt.err (!%p2438_p10)
}
  0x5b   : > { %s2587_s13 = smov 64   ;;  %s2588_s22 = smov 4  }
  0x5c   : > { %2180 = dma.hbm_to_vmem [thread:$0]  (!%p2685_p11), %s3112_s5, 2048, %s255_s16, [#allocation9], %s2587_s13, %s2587_s13, %s2588_s22  }
  0x5d   : > { %s2760_s17 = sadd.s32 1, %s2580_s27   ;;  %s34_s19 = sadd.s32 1, %s2576_s26 }
  0x5e   : > { %s31_s18 = ssub.s32 %s2580_s27, %s2760_s17  ;;  %p41_p9 = scmp.ne.s32.totalorder %s2576_s26, %s2572_s25 }
  0x5f   : > { %p32_p13 = scmp.eq.s32.totalorder %s31_s18, 0  ;;  %p42_p12 = scmp.eq.s32.totalorder %s2580_s27, 0 }
  0x60   : > { %p2195_p2 = scmp.lt.s32.totalorder %s2580_s27, 2  ;;  %p3127_p4 = scmp.eq.s32.totalorder %s2657_s28, 1 }
  0x61   : > { %s2770_s20 = scalar_select %p32_p13, %s2576_s26, %s34_s19  }
  0x62   : > { %p43_p1 = por %p42_p12, %p41_p9  ;;  %p2774_p6 = por %p3127_p4, %p41_p9 }
  0x63   : > { %s2779_s21 = sand.u32 1, %s2576_s26   ;;  %s1872_s16 = sshll.u32 %s2580_s27, 7 }
  0x64   : > { %s3128_s14 = scalar_select %p2774_p6, 1, 0 }
  0x65   : > { %s1871_s23 = sshll.u32 %s2779_s21, 3  ;;  %s3129_s0 = sld [smem:[#allocation17_spill]] }
  0x66   : > { %s275_s13 = scalar_lea.vmem [#allocation2], %s1871_s23  ;;  %p2788_p11 = pnand %p2195_p2, %p43_p1 }
  0x67   : > { %s282_s22 = sshll.u32 %s275_s13, 4  ;;  %s272_s18 = scalar_lea.sflag [#allocation3], %s2779_s21  ;;  %s2792_s22 = int_to_ptr.vmem [resolvable:$true] %s282_s22 }
  0x68   : > { %p2444_p0 = pneg %p2788_p11 }
  0x6b   : > { %s2786_s15 = scalar_lea.hbm %s3129_s0, %s1872_s16  ;;  %s2447_s29 = scalar_lea.hbm %s3129_s0, 256 }
  0x6c   : > { %s2442_s19 = scalar_lea.hbm %s2786_s15, 128  ;;  %p2448_p7 = scmp.lt.u32.totalorder %s2786_s15, %s3129_s0 }
  0x6d   : > { %p2443_p8 = scmp.ne.s32.totalorder %s2786_s15, %s2442_s19  ;;  %p2449_p10 = scmp.lt.u32.totalorder %s2447_s29, %s2442_s19 }
  0x6e   : > { %p2451_p9 = scmp.lt.u32.totalorder %s2442_s19, %s2786_s15 }
  0x6f   : > { %p2445_p3 = pnand %p2444_p0, %p2443_p8  ;;  %p2450_p13 = por %p2449_p10, %p2448_p7 }
  0x71   : > { %p2446_p5 = pneg %p2445_p3  ;;  %p2452_p12 = por %p2451_p9, %p2450_p13 }
  0x73   : > { %p2453_p2 = pnand %p2452_p12, %p2446_p5 }
  0x75   : > { %2456 = shalt.err (!%p2453_p2)
}
  0x76   : > { %s2457_s12 = scalar_lea.vmem %s2792_s22, 128  ;;  %s2589_s16 = smov [#allocation2]  }
  0x77   : > { %p2458_p1 = scmp.ne.s32.totalorder %s2792_s22, %s2457_s12  ;;  %s2462_s23 = sshll.u32 %s2589_s16, 4  ;;  %s2463_s23 = int_to_ptr.vmem [resolvable:$false] %s2462_s23 }
  0x78   : > { %s2464_s11 = scalar_lea.vmem %s2463_s23, 256  ;;  %p2465_p3 = scmp.lt.s32.totalorder %s2792_s22, %s2463_s23 }
  0x79   : > { %p2460_p4 = pnand %p2458_p1, %p2444_p0  ;;  %p2466_p7 = scmp.lt.s32.totalorder %s2464_s11, %s2457_s12 }
  0x7b   : > { %p2461_p8 = pneg %p2460_p4  ;;  %p2467_p10 = por %p2466_p7, %p2465_p3 }
  0x7d   : > { %p2468_p13 = pnand %p2467_p10, %p2461_p8 }
  0x7f   : > { %2471 = shalt.err (!%p2468_p13)
}
  0x80   : > { %2184 = dma.hbm_to_vmem [thread:$0]  (!%p2788_p11), %s2786_s15, 128, %s2792_s22, %s272_s18  }
  0x81   : > { %s1873_s19 = sshll.u32 %s2580_s27, 4  ;;  %s292_s12 = scalar_lea.vmem [#allocation5], %s2779_s21 }
  0x82   : > { %s2825_s16 = scalar_lea.hbm %s3108_s1, %s1873_s19  ;;  %s299_s23 = sshll.u32 %s292_s12, 4  ;;  %s300_s23 = int_to_ptr.vmem [resolvable:$true] %s299_s23 }
  0x83   : > { %s3131_s11 = sand.u32 1, %s2580_s27   ;;  %s2472_s2 = scalar_lea.hbm %s2825_s16, 16 }
  0x84   : > { %s290_s0 = scalar_lea.sflag [#allocation6], %s3131_s11  ;;  %p2473_p5 = scmp.ne.s32.totalorder %s2825_s16, %s2472_s2 }
  0x85   : > { %s2477_s18 = scalar_lea.hbm %s3108_s1, 32  ;;  %p2478_p2 = scmp.lt.u32.totalorder %s2825_s16, %s3108_s1 }
  0x86   : > { %p2475_p9 = pnand %p2473_p5, %p2444_p0  ;;  %p2479_p1 = scmp.lt.u32.totalorder %s2477_s18, %s2472_s2 }
  0x87   : > { %p2481_p8 = scmp.lt.u32.totalorder %s2472_s2, %s2825_s16 }
  0x88   : > { %p2476_p12 = pneg %p2475_p9  ;;  %p2480_p4 = por %p2479_p1, %p2478_p2 }
  0x8a   : > { %p2482_p3 = por %p2481_p8, %p2480_p4 }
  0x8c   : > { %p2483_p7 = pnand %p2482_p3, %p2476_p12 }
  0x8e   : > { %2486 = shalt.err (!%p2483_p7)
}
  0x8f   : > { %s2487_s21 = scalar_lea.vmem %s300_s23, 16  ;;  %s2590_s13 = smov [#allocation5]  }
  0x90   : > { %p2488_p10 = scmp.ne.s32.totalorder %s300_s23, %s2487_s21  ;;  %s2492_s12 = sshll.u32 %s2590_s13, 4  ;;  %s2493_s12 = int_to_ptr.vmem [resolvable:$false] %s2492_s12 }
  0x91   : > { %s2494_s11 = scalar_lea.vmem %s2493_s12, 32  ;;  %p2495_p9 = scmp.lt.s32.totalorder %s300_s23, %s2493_s12 }
  0x92   : > { %p2490_p13 = pnand %p2488_p10, %p2444_p0  ;;  %p2496_p6 = scmp.lt.s32.totalorder %s2494_s11, %s2487_s21 }
  0x94   : > { %p2491_p5 = pneg %p2490_p13  ;;  %p2497_p1 = por %p2496_p6, %p2495_p9 }
  0x96   : > { %p2498_p2 = pnand %p2497_p1, %p2491_p5 }
  0x98   : > { %2501 = shalt.err (!%p2498_p2)
}
  0x99   : > { %2187 = dma.hbm_to_vmem [thread:$0]  (!%p2788_p11), %s2825_s16, 16, %s300_s23, %s290_s0  }
  0x9a   : > { %p3132_p12 = scmp.ne.s32.totalorder %s3123_s9, 0 }
  0x9b   : > { %s2852_s2 = sand.u32 (!%p3132_p12), 1, %s2572_s25   ;;  %p3133_p6 = scmp.ne.s32.totalorder (!%p3132_p12), %s3121_s30, 0 }
  0x9c   : > { %308 = sbr.rel (%p3132_p12) target bundleno = 3699 (0xe73), region = 48  ;;  %s1875_s15 = sshll.u32 (!%p3132_p12), %s2852_s2, 3 }
  0x9d   : > { %s311_s22 = scalar_lea.sflag (!%p3132_p12), [#allocation3], %s2852_s2  ;;  %s2858_s18 = scalar_lea.vmem (!%p3132_p12), [#allocation2], %s1875_s15 }
  0xa3   : > { %2547 = dma.done.wait (%p3133_p6), %s311_s22, 128  }
  0xa4   : > { %2549 = vsyncadd (%p3133_p6), %s311_s22, 4294967168  ;;  %s319_s0 = sand.u32 1, %s2657_s28   ;;  %s322_s10 = scalar_lea.vmem [#allocation5], %s2852_s2 }
  0xa5   : > { %s320_s9 = scalar_lea.sflag [#allocation6], %s319_s0 }
  0xa6   : > { %2551 = dma.done.wait (%p3133_p6), %s320_s9, 16  }
  0xa7   : > { %2553 = vsyncadd (%p3133_p6), %s320_s9, 4294967280  ;;  %p3134_p11 = scmp.eq.s32.totalorder %s2657_s28, 0 }
  0xa9   : > { %2555 = dma.done.wait (%p3134_p11), [#allocation6], 128   ;;  %p3135_p0 = pmov %p3134_p11 }
  0xab   : > { %2557 = vsyncadd (%p3135_p0), [#allocation6], 4294967168  ;;  %p3136_p4 = pmov %p3135_p0 }
  0xac   : > { %p3137_p8 = pmov %p3135_p0 }
  0xad   : > { %2559 = dma.done.wait (%p3136_p4), [#allocation9], 8192  }
  0xae   : > { %2561 = vsyncadd (%p3137_p8), [#allocation9], 4294959104  ;;  %v370_v0 = vld [vmem:[%s2858_s18] sm:$0xff]  ;;  %v2591_v7 = vmov 0.0   ;;  %v2592_v10 = vmov 0   ;;  %vm2593_vm0 = vmmov 0   ;;  %v385_v33 = vlaneseq }
  0xaf   : > { %373 = vadd.xlane.f32.xlu0 %v370_v0  ;;  %v2243_v5 = vld [vmem:[#allocation8 + $0x4] ss:$12 sps:$4 sm:$0xff]   ;;  %v2245_v6 = vld [vmem:[#allocation8] ss:$12 sps:$4 sm:$0xff]   ;;  %2017 = vmatprep.subr.bf16.mxu1 %v2591_v7  ;;  %v2246_v8 = vld [vmem:[#allocation8 + $0x8] ss:$12 sps:$4 sm:$0xff]  }
  0xb0   : > { %v2247_v9 = vld [vmem:[#allocation8 + $0x1c] ss:$12 sps:$4 sm:$0xff]   ;;  %639 = vmatprep.mubr.bf16.mxu0 %v2592_v10  ;;  %607 = vmatprep.subr.bf16.mxu0 %v2243_v5  ;;  %v2249_v11 = vld [vmem:[#allocation8 + $0x18] ss:$12 sps:$4 sm:$0xff]   ;;  %v2250_v12 = vld [vmem:[#allocation8 + $0x20] ss:$12 sps:$4 sm:$0xff]  }
  0xb1   : > { %608 = vmatpush1.bf16.msra.mxu0 %v2245_v6  ;;  %2018 = vmatpush3.bf16.msra.mxu1 %v2246_v8  ;;  %v2251_v13 = vld [vmem:[#allocation8 + $0x34] ss:$12 sps:$4 sm:$0xff]   ;;  %v2253_v14 = vld [vmem:[#allocation8 + $0x30] ss:$12 sps:$4 sm:$0xff]   ;;  %v2254_v15 = vld [vmem:[#allocation8 + $0x38] ss:$12 sps:$4 sm:$0xff]  }
  0xb2   : > { %609 = vmatprep.subr.bf16.mxu0 %v2247_v9  ;;  %2019 = vmatprep.subr.bf16.mxu1 %v2591_v7  ;;  %v2255_v16 = vld [vmem:[#allocation8 + $0x4c] ss:$12 sps:$4 sm:$0xff]   ;;  %v2257_v17 = vld [vmem:[#allocation8 + $0x48] ss:$12 sps:$4 sm:$0xff]   ;;  %v2258_v18 = vld [vmem:[#allocation8 + $0x50] ss:$12 sps:$4 sm:$0xff]  }
  0xb3   : > { %2033 = vmatprep.mubr.msk.bf16.mxu1 %vm2593_vm0, %v2591_v7  ;;  %v2259_v19 = vld [vmem:[#allocation8 + $0x64] ss:$12 sps:$4 sm:$0xff]   ;;  %v2261_v20 = vld [vmem:[#allocation8 + $0x60] ss:$12 sps:$4 sm:$0xff]   ;;  %v2262_v21 = vld [vmem:[#allocation8 + $0x68] ss:$12 sps:$4 sm:$0xff]  }
  0xb4   : > { %v2263_v22 = vld [vmem:[#allocation8 + $0x7c] ss:$12 sps:$4 sm:$0xff]   ;;  %v2265_v23 = vld [vmem:[#allocation8 + $0x78] ss:$12 sps:$4 sm:$0xff]   ;;  %v2266_v24 = vld [vmem:[#allocation8 + $0x80] ss:$12 sps:$4 sm:$0xff]  }
  0xb5   : > { %610 = vmatpush1.bf16.msra.mxu0 %v2249_v11  ;;  %2020 = vmatpush3.bf16.msra.mxu1 %v2250_v12  ;;  %v2267_v25 = vld [vmem:[#allocation8 + $0x94] ss:$12 sps:$4 sm:$0xff]   ;;  %v2269_v26 = vld [vmem:[#allocation8 + $0x90] ss:$12 sps:$4 sm:$0xff]   ;;  %v2270_v27 = vld [vmem:[#allocation8 + $0x98] ss:$12 sps:$4 sm:$0xff]  }
  0xb6   : > { %611 = vmatprep.subr.bf16.mxu0 %v2251_v13  ;;  %2021 = vmatprep.subr.bf16.mxu1 %v2591_v7  ;;  %v2271_v28 = vld [vmem:[#allocation8 + $0xac] ss:$12 sps:$4 sm:$0xff]   ;;  %v2273_v29 = vld [vmem:[#allocation8 + $0xa8] ss:$12 sps:$4 sm:$0xff]   ;;  %v2274_v30 = vld [vmem:[#allocation8 + $0xb0] ss:$12 sps:$4 sm:$0xff]  }
  0xb7   : > { %v2896_v35 = vshrl.u32 %v385_v33, 7  ;;  %v2901_v37 = vld [vmem:[#allocation7] sm:$0xff]  ;;  %v2919_v52 = vld [vmem:[%s3110_s3] sm:$0x3f]  ;;  %vm706_vm1 = vcmask 523264   ;;  %s2594_s23 = smov 64  }
  0xb8   : > { %vm827_vm2 = vcmask 1043456   ;;  %vm799_vm3 = vcmask 64512   ;;  %vm1043_vm4 = vcmask 261120   ;;  %s1959_s12 = sshll.u32 %s2657_s28, 7  ;;  %s368_s11 = scalar_lea.vmem [#allocation11], %s1875_s15 }
  0xb9   : > { %612 = vmatpush1.bf16.msra.mxu0 %v2253_v14  ;;  %2022 = vmatpush3.bf16.msra.mxu1 %v2254_v15  ;;  %v2899_v36 = vsub.s32 0, %v2896_v35  ;;  %v2904_v38 = vsub.s32 1, %v2896_v35  ;;  %v458_v51 = vsub.s32 2, %v2896_v35  ;;  %v462_v6 = vsub.s32 4, %v2896_v35  ;;  %s1747_s22 = sshll.u32 %s368_s11, 4  ;;  %s1734_s28 = scalar_lea.sflag [#allocation4], %s2852_s2  ;;  %s3065_s22 = int_to_ptr.vmem [resolvable:$true] %s1747_s22 }
  0xba   : > { %613 = vmatprep.subr.bf16.mxu0 %v2255_v16  ;;  %2023 = vmatprep.subr.bf16.mxu1 %v2591_v7  ;;  %s2502_s15 = scalar_lea.vmem %s3065_s22, 128  ;;  %p3138_p7 = scmp.ne.s32.totalorder %s3128_s14, 0 }
  0xbb   : > { %v388_v39 = vrot.slane %v2901_v37, %v2899_v36  ;;  %v393_v42 = vrot.slane %v2901_v37, %v2904_v38  ;;  %v459_v53 = vrot.slane %v2919_v52, %v458_v51  ;;  %v455_v54 = vrot.slane %v2919_v52, %v2899_v36  ;;  %p2503_p3 = scmp.ne.s32.totalorder %s3065_s22, %s2502_s15 }
  0xbc   : > { %v463_v8 = vrot.slane %v2919_v52, %v462_v6 }
  0xbd   : > { %614 = vmatpush1.bf16.msra.mxu0 %v2257_v17  ;;  %2024 = vmatpush3.bf16.msra.mxu1 %v2258_v18  ;;  %v474_v55 = vrot.slane %v459_v53, %v2899_v36  ;;  %v470_v60 = vrot.slane %v455_v54, %v2899_v36  ;;  %p2504_p10 = pnand %p2503_p3, %p3138_p7 }
  0xbe   : > { %615 = vmatprep.subr.bf16.mxu0 %v2259_v19  ;;  %2025 = vmatprep.subr.bf16.mxu1 %v2591_v7  ;;  %v478_v9 = vrot.slane %v463_v8, %v2899_v36 }
  0xbf   : > { %p2505_p13 = pneg %p2504_p10 }
  0xc1   : > { %616 = vmatpush1.bf16.msra.mxu0 %v2261_v20  ;;  %2026 = vmatpush3.bf16.msra.mxu1 %v2262_v21 }
  0xc2   : > { %617 = vmatprep.subr.bf16.mxu0 %v2263_v22  ;;  %2027 = vmatprep.subr.bf16.mxu1 %v2591_v7 }
  0xc5   : > { %618 = vmatpush1.bf16.msra.mxu0 %v2265_v23  ;;  %2028 = vmatpush3.bf16.msra.mxu1 %v2266_v24 }
  0xc6   : > { %619 = vmatprep.subr.bf16.mxu0 %v2267_v25  ;;  %2029 = vmatprep.subr.bf16.mxu1 %v2591_v7 }
  0xc9   : > { %620 = vmatpush1.bf16.msra.mxu0 %v2269_v26  ;;  %2030 = vmatpush3.bf16.msra.mxu1 %v2270_v27 }
  0xca   : > { %621 = vmatprep.subr.bf16.mxu0 %v2271_v28  ;;  %2031 = vmatprep.subr.bf16.mxu1 %v2591_v7 }
  0xcd   : > { %622 = vmatpush1.bf16.msra.mxu0 %v2273_v29  ;;  %2032 = vmatpush3.bf16.msra.mxu1 %v2274_v30 }
  0xce   : > { %2037 = vmatprep.subr.bf16.mxu0 %v2591_v7  ;;  %2055 = vmatprep.subr.bf16.mxu1 %v2591_v7 }
 0x13c   : > { %v374_v1 = vpop.xlane.xlu0 %373 }
 0x13d   : > { %v376_v2 = vmul.f32 0.0078125, %v374_v1 }
 0x13f   : > { %v2879_v3 = vsub.f32 %v370_v0, %v376_v2 }
 0x141   : > { %v378_v4 = vmul.f32 %v2879_v3, %v2879_v3 }
 0x143   : > { %379 = vadd.xlane.f32.xlu0 %v378_v4 }
 0x1d0   : > { %v380_v31 = vpop.xlane.xlu0 %379 }
 0x1d1   : > { %v381_v32 = vmul.f32 0.0078125, %v380_v31 }
 0x1d3   : > { %v382_v34 = vadd.f32 1e-05, %v381_v32 }
 0x1d5   : > { %2325 = vrsqrt.f32 %v382_v34 }
 0x1df   : > { %v2326_v40 = vpop.eup %2325 }
 0x1e0   : > { %v384_v41 = vmul.f32 %v2326_v40, %v2879_v3 }
 0x1e2   : > { %v389_v43 = vmul.f32 %v388_v39, %v384_v41 }
 0x1e4   : > { %v394_v44 = vadd.f32 %v393_v42, %v389_v43 }
 0x1e6   : > { %v1880_v45 = vmul.f32 -1.442695, %v394_v44 }
 0x1e8   : > { %2327 = vpow2.f32 %v1880_v45 }
 0x1f2   : > { %v2328_v46 = vpop.eup %2327 }
 0x1f3   : > { %v398_v47 = vadd.f32 1.0, %v2328_v46 }
 0x1f5   : > { %2329 = vrcp.f32 %v398_v47 }
 0x1ff   : > { %v2330_v48 = vpop.eup %2329 }
 0x200   : > { %v401_v49 = vmul.f32 %v2330_v48, %v394_v44 }
 0x202   : > { %v450_v50 = vpack.c.bf16 %v401_v49, %v401_v49 }
 0x204   : > { %640 = vmatmul.mubr.bf16.vlgmr.msra.gmra.mrb[0].mxu0 %v450_v50  ;;  %2034 = vmatmul.mubr.bf16.vlgmr.msra.gmra.mrb[0].mxu1 %v450_v50 }
 0x205   : > { %2039 = vmatprep.mubr.msk.bf16.mxu0 %vm2593_vm0, %v2591_v7  ;;  %2057 = vmatprep.mubr.msk.bf16.mxu1 %vm2593_vm0, %v2591_v7 }
 0x2d7   : > { %v641_v56 = vpop.f32.mrb[0].mxu0  ;;  %v682_v57 = vpop.f32.mrb[0].mxu1 }
 0x2d8   : > { %v643_v58 = vpop.f32.mrb[1].mxu0  ;;  %v2035_v59 = vpop.f32.mrb[1].mxu1  ;;  %v642_v3 = vadd.f32 %v641_v56, %v470_v60  ;;  %v683_v13 = vadd.f32 %v682_v57, %v478_v9  ;;  %v2275_v56 = vld [vmem:[#allocation10] sm:$0xff]  }
 0x2d9   : > { %v644_v61 = vadd.f32 %v643_v58, %v474_v55  ;;  %v645_v62 = vpop.f32.mrb[2].mxu0  ;;  %v685_v63 = vpop.f32.mrb[2].mxu1  ;;  %v2280_v57 = vld [vmem:[%s3113_s6] sm:$0xff]   ;;  %v2282_v59 = vld [vmem:[%s3113_s6 + $0x8] sm:$0xff]  }
 0x2da   : > { %v646_v0 = vpop.f32.mrb[3].mxu0  ;;  %v2036_v1 = vpop.f32.mrb[3].mxu1  ;;  %v692_v5 = vpack.c.bf16 %v642_v3, %v642_v3  ;;  %v704_v16 = vpack.c.bf16 %v683_v13, %v683_v13  ;;  %v2276_v58 = vld [vmem:[#allocation10 + $0x8] sm:$0xff]   ;;  %v1015_v60 = vld [vmem:[%s322_s10] sm:$0x1]  ;;  %v2277_v62 = vld [vmem:[#allocation10 + $0x10] sm:$0xff]   ;;  %s3063_s10 = scalar_lea.hbm %s3114_s7, %s1959_s12 }
 0x2db   : > { %v698_v2 = vpack.c.bf16 %v644_v61, %v644_v61  ;;  %695 = vrot.lane.b32.xlu1 %v644_v61, %s2594_s23  ;;  %v1917_v61 = vmul.f32 -1.442695, %v1015_v60  ;;  %v2278_v63 = vld [vmem:[#allocation10 + $0x18] sm:$0xff]   ;;  %v2279_v0 = vld [vmem:[#allocation10 + $0x20] sm:$0xff]  }
 0x2dc   : > { %v829_v18 = vsel %vm827_vm2, %v704_v16, 0 }
 0x2dd   : > { %v711_v4 = vsel %vm706_vm1, %v698_v2, 0 }
 0x2de   : > { %2038 = vmatpush3.bf16.xpose.msra.mxu0 %v711_v4  ;;  %v2283_v4 = vld [vmem:[#allocation10 + $0x30] sm:$0xff]  }
 0x2df   : > { %689 = vrot.lane.b32.xlu1 %v642_v3, %s2594_s23  ;;  %2043 = vmatprep.subr.bf16.mxu0 %v2591_v7  ;;  %v2281_v3 = vld [vmem:[#allocation10 + $0x28] sm:$0xff]  }
 0x2e5   : > { %2040 = vmatmul.mubr.msk.bf16.vlgmr.msra.gmra.mrb[4].mxu0 %vm706_vm1, %v692_v5 }
 0x2e6   : > { %2045 = vmatprep.mubr.msk.bf16.mxu0 %vm2593_vm0, %v2591_v7 }
 0x34d   : > { %v696_v11 = vpop.permute.xlu1 %695 }
 0x34e   : > { %v699_v12 = vpack.c.bf16 %v696_v11, %v696_v11  ;;  %v2284_v11 = vld [vmem:[#allocation10 + $0x38] sm:$0xff]  }
 0x350   : > { %v757_v14 = vsel %vm706_vm1, %v699_v12, 0 }
 0x351   : > { %2044 = vmatpush3.bf16.xpose.msra.mxu0 %v757_v14  ;;  %v690_v15 = vpop.permute.xlu1 %689 }
 0x352   : > { %2049 = vmatprep.subr.bf16.mxu0 %v2591_v7  ;;  %v693_v17 = vpack.c.bf16 %v690_v15, %v690_v15 }
 0x358   : > { %2046 = vmatmul.mubr.msk.bf16.vlgmr.msra.gmra.mrb[8].mxu0 %vm706_vm1, %v693_v17 }
 0x359   : > { %2050 = vmatpush3.bf16.msra.mxu0 %v829_v18  ;;  %2051 = vmatprep.mubr.msk.bf16.mxu0 %vm2593_vm0, %v2591_v7 }
 0x35a   : > { %2061 = vmatprep.subr.bf16.mxu0 %v2591_v7 }
 0x3b8   : > { %v747_v19 = vpop.f32.mrb[4].mxu0 }
 0x3b9   : > { %v2041_v20 = vpop.f32.mrb[5].mxu0  ;;  %v800_v21 = vsel %vm799_vm3, %v747_v19, -inf }
 0x3ba   : > { %801 = vmax.xlane.f32.xlu1 %v800_v21  ;;  %v750_v22 = vpop.f32.mrb[6].mxu0 }
 0x3bb   : > { %v2042_v23 = vpop.f32.mrb[7].mxu0 }
 0x42b   : > { %v793_v24 = vpop.f32.mrb[8].mxu0 }
 0x42c   : > { %v2047_v25 = vpop.f32.mrb[9].mxu0  ;;  %v803_v26 = vsel %vm799_vm3, %v793_v24, -inf }
 0x42d   : > { %804 = vmax.xlane.f32.xlu0 %v803_v26  ;;  %v796_v27 = vpop.f32.mrb[10].mxu0  ;;  %v1041_v26 = vrot.slane %v2901_v37, 6 }
 0x42e   : > { %v2048_v28 = vpop.f32.mrb[11].mxu0 }
 0x42f   : > { %v926_v28 = vrot.slane %v2901_v37, %v462_v6  ;;  %v2288_v6 = vld [vmem:[#allocation8 + $0xc8] ss:$12 sps:$4 sm:$0xff]  }
 0x447   : > { %v802_v34 = vpop.xlane.xlu1 %801 }
 0x448   : > { %v806_v39 = vsub.f32 %v747_v19, %v802_v34 }
 0x44a   : > { %v808_v40 = vmul.f32 1.442695, %v806_v39 }
 0x4ba   : > { %v805_v29 = vpop.xlane.xlu0 %804 }
 0x4bb   : > { %v807_v30 = vsub.f32 %v793_v24, %v805_v29 }
 0x4bd   : > { %v810_v31 = vmul.f32 1.442695, %v807_v30 }
 0x4bf   : > { %2331 = vpow2.f32 %v810_v31 }
 0x4c0   : > { %2333 = vpow2.f32 %v808_v40 }
 0x4c9   : > { %v2332_v32 = vpop.eup %2331 }
 0x4ca   : > { %v815_v33 = vsel %vm799_vm3, %v2332_v32, 0.0  ;;  %v2334_v41 = vpop.eup %2333 }
 0x4cb   : > { %816 = vadd.xlane.f32.xlu0 %v815_v33  ;;  %v812_v42 = vsel %vm799_vm3, %v2334_v41, 0.0 }
 0x4e1   : > { %701 = vrot.lane.b32.xlu0 %v683_v13, %s2594_s23 }
 0x500   : > { %813 = vadd.xlane.f32.xlu0 %v812_v42 }
 0x558   : > { %v817_v43 = vpop.xlane.xlu0 %816 }
 0x559   : > { %2335 = vrcp.f32 %v817_v43 }
 0x55c   : > { %v702_v44 = vpop.permute.xlu0 %701 }
 0x55d   : > { %v705_v45 = vpack.c.bf16 %v702_v44, %v702_v44  ;;  %v2285_v44 = vld [vmem:[#allocation8 + $0xc0] ss:$12 sps:$4 sm:$0xff]  }
 0x55f   : > { %v875_v46 = vsel %vm827_vm2, %v705_v45, 0  ;;  %v2287_v45 = vld [vmem:[#allocation8 + $0xc4] ss:$12 sps:$4 sm:$0xff]  }
 0x560   : > { %2056 = vmatpush3.bf16.msra.mxu1 %v875_v46  ;;  %v2291_v46 = vld [vmem:[#allocation8 + $0xdc] ss:$12 sps:$4 sm:$0xff]  }
 0x561   : > { %2081 = vmatprep.subr.bf16.mxu1 %v2591_v7 }
 0x563   : > { %v2336_v47 = vpop.eup %2335 }
 0x564   : > { %v821_v48 = vmul.f32 %v2336_v47, %v2332_v32  ;;  %v2289_v47 = vld [vmem:[#allocation8 + $0xd8] ss:$12 sps:$4 sm:$0xff]  }
 0x566   : > { %v823_v49 = vpack.c.bf16 %v821_v48, %v821_v48  ;;  %v2295_v48 = vld [vmem:[#allocation8 + $0xf4] ss:$12 sps:$4 sm:$0xff]  }
 0x568   : > { %2058 = vmatmul.mubr.msk.bf16.vlgmr.msra.gmra.mrb[4].mxu1 %vm799_vm3, %v823_v49  ;;  %v2296_v49 = vld [vmem:[#allocation8 + $0xf8] ss:$12 sps:$4 sm:$0xff]  }
 0x569   : > { %2085 = vmatprep.mubr.msk.bf16.mxu1 %vm2593_vm0, %v2591_v7  ;;  %2082 = vmatpush3.bf16.msra.mxu1 %v2280_v57  ;;  %v2304_v57 = vld [vmem:[#allocation8 + $0x128] ss:$12 sps:$4 sm:$0xff]  }
 0x56a   : > { %2083 = vmatprep.subr.bf16.mxu1 %v2591_v7 }
 0x56d   : > { %2084 = vmatpush3.bf16.msra.mxu1 %v2282_v59  ;;  %v2307_v59 = vld [vmem:[#allocation8 + $0x13c] ss:$12 sps:$4 sm:$0xff]  }
 0x56e   : > { %1326 = vmatprep.subr.bf16.mxu1 %v2287_v45 }
 0x58d   : > { %v814_v50 = vpop.xlane.xlu0 %813 }
 0x58e   : > { %2337 = vrcp.f32 %v814_v50  ;;  %v2293_v50 = vld [vmem:[#allocation8 + $0xf0] ss:$12 sps:$4 sm:$0xff]  }
 0x58f   : > { %2339 = vpow2.f32 %v1917_v61  ;;  %v2305_v61 = vld [vmem:[#allocation8 + $0x138] ss:$12 sps:$4 sm:$0xff]  }
 0x598   : > { %v2338_v53 = vpop.eup %2337 }
 0x599   : > { %v820_v54 = vmul.f32 %v2338_v53, %v2334_v41  ;;  %v2340_v1 = vpop.eup %2339  ;;  %v2299_v53 = vld [vmem:[#allocation8 + $0x10c] ss:$12 sps:$4 sm:$0xff]  }
 0x59a   : > { %v1019_v2 = vadd.f32 1.0, %v2340_v1  ;;  %v2315_v1 = vld [vmem:[#allocation8 + $0x16c] ss:$12 sps:$4 sm:$0xff]  }
 0x59b   : > { %v822_v55 = vpack.c.bf16 %v820_v54, %v820_v54  ;;  %v2300_v54 = vld [vmem:[#allocation8 + $0x110] ss:$12 sps:$4 sm:$0xff]  }
 0x59c   : > { %2341 = vrcp.f32 %v1019_v2  ;;  %v2316_v2 = vld [vmem:[#allocation8 + $0x170] ss:$12 sps:$4 sm:$0xff]  }
 0x59d   : > { %2052 = vmatmul.mubr.msk.bf16.vlgmr.msra.gmra.mrb[12].mxu0 %vm799_vm3, %v822_v55  ;;  %v2297_v55 = vld [vmem:[#allocation8 + $0x108] ss:$12 sps:$4 sm:$0xff]  }
 0x59e   : > { %2077 = vmatprep.mubr.msk.bf16.mxu0 %vm2593_vm0, %v2591_v7  ;;  %2062 = vmatpush3.bf16.msra.mxu0 %v2275_v56  ;;  %v2303_v56 = vld [vmem:[#allocation8 + $0x124] ss:$12 sps:$4 sm:$0xff]  }
 0x59f   : > { %2063 = vmatprep.subr.bf16.mxu0 %v2591_v7 }
 0x5a2   : > { %2064 = vmatpush3.bf16.msra.mxu0 %v2276_v58  ;;  %v2301_v58 = vld [vmem:[#allocation8 + $0x120] ss:$12 sps:$4 sm:$0xff]  }
 0x5a3   : > { %2065 = vmatprep.subr.bf16.mxu0 %v2591_v7 }
 0x5a6   : > { %2066 = vmatpush3.bf16.msra.mxu0 %v2277_v62  ;;  %v2342_v5 = vpop.eup %2341  ;;  %v2311_v62 = vld [vmem:[#allocation8 + $0x154] ss:$12 sps:$4 sm:$0xff]  }
 0x5a7   : > { %2067 = vmatprep.subr.bf16.mxu0 %v2591_v7  ;;  %v1022_v8 = vmul.f32 %v2342_v5, %v1015_v60  ;;  %v2308_v60 = vld [vmem:[#allocation8 + $0x140] ss:$12 sps:$4 sm:$0xff]  }
 0x5a9   : > { %v1023_v9 = vpack.c.bf16 %v1022_v8, %v1022_v8 }
 0x5aa   : > { %2068 = vmatpush3.bf16.msra.mxu0 %v2278_v63  ;;  %v2312_v63 = vld [vmem:[#allocation8 + $0x158] ss:$12 sps:$4 sm:$0xff]  }
 0x5ab   : > { %2069 = vmatprep.subr.bf16.mxu0 %v2591_v7  ;;  %2086 = vmatmul.mubr.msk.bf16.vlgmr.msra.gmra.mrb[8].mxu1 %vm1043_vm4, %v1023_v9  ;;  %v1110_v9 = vsub.s32 3, %v2896_v35 }
 0x5ac   : > { %1358 = vmatprep.mubr.bf16.mxu1 %v2592_v10  ;;  %1327 = vmatpush1.bf16.msra.mxu1 %v2285_v44 }
 0x5ad   : > { %1328 = vmatprep.subr.bf16.mxu1 %v2291_v46 }
 0x5ae   : > { %2070 = vmatpush3.bf16.msra.mxu0 %v2279_v0  ;;  %v2309_v0 = vld [vmem:[#allocation8 + $0x150] ss:$12 sps:$4 sm:$0xff]  }
 0x5af   : > { %2071 = vmatprep.subr.bf16.mxu0 %v2591_v7 }
 0x5b0   : > { %1329 = vmatpush1.bf16.msra.mxu1 %v2289_v47 }
 0x5b1   : > { %1330 = vmatprep.subr.bf16.mxu1 %v2295_v48 }
 0x5b2   : > { %2072 = vmatpush3.bf16.msra.mxu0 %v2281_v3  ;;  %v2313_v3 = vld [vmem:[#allocation8 + $0x168] ss:$12 sps:$4 sm:$0xff]  }
 0x5b3   : > { %2073 = vmatprep.subr.bf16.mxu0 %v2591_v7 }
 0x5b4   : > { %1331 = vmatpush1.bf16.msra.mxu1 %v2293_v50 }
 0x5b5   : > { %1332 = vmatprep.subr.bf16.mxu1 %v2299_v53 }
 0x5b6   : > { %2074 = vmatpush3.bf16.msra.mxu0 %v2283_v4 }
 0x5b7   : > { %2075 = vmatprep.subr.bf16.mxu0 %v2591_v7 }
 0x5b8   : > { %1333 = vmatpush1.bf16.msra.mxu1 %v2297_v55 }
 0x5b9   : > { %1334 = vmatprep.subr.bf16.mxu1 %v2303_v56 }
 0x5ba   : > { %2076 = vmatpush3.bf16.msra.mxu0 %v2284_v11  ;;  %v1106_v11 = vrot.slane %v2901_v37, %v458_v51  ;;  %v1178_v51 = vrot.slane %v2919_v52, %v1110_v9 }
 0x5bb   : > { %2089 = vmatprep.subr.bf16.mxu0 %v2591_v7 }
 0x5bc   : > { %1335 = vmatpush1.bf16.msra.mxu1 %v2301_v58 }
 0x5bd   : > { %1336 = vmatprep.subr.bf16.mxu1 %v2307_v59 }
 0x5c0   : > { %1337 = vmatpush1.bf16.msra.mxu1 %v2305_v61 }
 0x5c1   : > { %1338 = vmatprep.subr.bf16.mxu1 %v2311_v62 }
 0x5c4   : > { %1339 = vmatpush1.bf16.msra.mxu1 %v2309_v0 }
 0x5c5   : > { %1340 = vmatprep.subr.bf16.mxu1 %v2315_v1 }
 0x5c8   : > { %1341 = vmatpush1.bf16.msra.mxu1 %v2313_v3 }
 0x5c9   : > { %2109 = vmatprep.subr.bf16.mxu1 %v2591_v7 }
 0x63b   : > { %v911_v12 = vpop.f32.mrb[4].mxu1 }
 0x63c   : > { %918 = vrot.lane.b32.xlu1 %v911_v12, %s2594_s23  ;;  %v2059_v13 = vpop.f32.mrb[5].mxu1 }
 0x63d   : > { %v914_v14 = vpop.f32.mrb[6].mxu1 }
 0x63e   : > { %v2060_v15 = vpop.f32.mrb[7].mxu1  ;;  %v1111_v14 = vrot.slane %v2901_v37, %v1110_v9 }
 0x670   : > { %v865_v16 = vpop.f32.mrb[12].mxu0 }
 0x671   : > { %v2053_v17 = vpop.f32.mrb[13].mxu0 }
 0x672   : > { %v868_v18 = vpop.f32.mrb[14].mxu0 }
 0x673   : > { %v2054_v19 = vpop.f32.mrb[15].mxu0 }
 0x67e   : > { %v1081_v10 = vpop.f32.mrb[8].mxu1 }
 0x67f   : > { %v2087_v23 = vpop.f32.mrb[9].mxu1  ;;  %v1082_v27 = vadd.f32 %v1081_v10, %v1041_v26  ;;  %v1174_v10 = vrot.slane %v2919_v52, %v2904_v38 }
 0x680   : > { %v1084_v24 = vpop.f32.mrb[10].mxu1  ;;  %v1193_v23 = vrot.slane %v1178_v51, %v2904_v38  ;;  %v2319_v51 = vld [vmem:[#allocation10 + $0x50] sm:$0xff]  }
 0x681   : > { %v2088_v25 = vpop.f32.mrb[11].mxu1  ;;  %v1090_v29 = vrot.slane %v1082_v27, %v2899_v36  ;;  %v2292_v36 = vld [vmem:[#allocation8 + $0xe0] ss:$12 sps:$4 sm:$0xff]  }
 0x6ae   : > { %v919_v20 = vpop.permute.xlu1 %918 }
 0x6af   : > { %v921_v21 = vsel %vm706_vm1, %v865_v16, %v919_v20 }
 0x6b0   : > { %v922_v22 = vpack.c.bf16 %v921_v21, %v921_v21 }
 0x6b2   : > { %2078 = vmatmul.mubr.bf16.vlgmr.msra.gmra.mrb[16].mxu0 %v922_v22 }
 0x6b3   : > { %2105 = vmatprep.mubr.msk.bf16.mxu0 %vm2593_vm0, %v2591_v7  ;;  %2090 = vmatpush3.bf16.msra.mxu0 %v2288_v6 }
 0x6b4   : > { %2091 = vmatprep.subr.bf16.mxu0 %v2591_v7 }
 0x6b7   : > { %2092 = vmatpush3.bf16.msra.mxu0 %v2292_v36 }
 0x6b8   : > { %2093 = vmatprep.subr.bf16.mxu0 %v2591_v7 }
 0x6bb   : > { %2094 = vmatpush3.bf16.msra.mxu0 %v2296_v49 }
 0x6bc   : > { %2095 = vmatprep.subr.bf16.mxu0 %v2591_v7 }
 0x6bf   : > { %2096 = vmatpush3.bf16.msra.mxu0 %v2300_v54 }
 0x6c0   : > { %2097 = vmatprep.subr.bf16.mxu0 %v2591_v7 }
 0x6c3   : > { %2098 = vmatpush3.bf16.msra.mxu0 %v2304_v57 }
 0x6c4   : > { %2099 = vmatprep.subr.bf16.mxu0 %v2591_v7 }
 0x6c7   : > { %2100 = vmatpush3.bf16.msra.mxu0 %v2308_v60 }
 0x6c8   : > { %2101 = vmatprep.subr.bf16.mxu0 %v2591_v7 }
 0x6cb   : > { %2102 = vmatpush3.bf16.msra.mxu0 %v2312_v63 }
 0x6cc   : > { %2103 = vmatprep.subr.bf16.mxu0 %v2591_v7 }
 0x6cf   : > { %2104 = vmatpush3.bf16.msra.mxu0 %v2316_v2 }
 0x6d0   : > { %2127 = vmatprep.subr.bf16.mxu0 %v2591_v7 }
 0x785   : > { %v1009_v30 = vpop.f32.mrb[16].mxu0 }
 0x786   : > { %v1010_v31 = vadd.f32 %v1009_v30, %v926_v28  ;;  %v2079_v32 = vpop.f32.mrb[17].mxu0  ;;  %v1189_v28 = vrot.slane %v1174_v10, %v2904_v38  ;;  %v2320_v10 = vld [vmem:[#allocation10 + $0x58] sm:$0xff]  }
 0x787   : > { %v1012_v33 = vpop.f32.mrb[18].mxu0 }
 0x788   : > { %v2080_v34 = vpop.f32.mrb[19].mxu0  ;;  %v1091_v39 = vadd.f32 %v1090_v29, %v1010_v31 }
 0x78a   : > { %1092 = vadd.xlane.f32.xlu1 %v1091_v39 }
 0x817   : > { %v1093_v40 = vpop.xlane.xlu1 %1092 }
 0x818   : > { %v1094_v41 = vmul.f32 0.0078125, %v1093_v40 }
 0x81a   : > { %v2987_v42 = vsub.f32 %v1091_v39, %v1094_v41 }
 0x81c   : > { %v1096_v43 = vmul.f32 %v2987_v42, %v2987_v42 }
 0x81e   : > { %1097 = vadd.xlane.f32.xlu0 %v1096_v43 }
 0x8ab   : > { %v1098_v4 = vpop.xlane.xlu0 %1097 }
 0x8ac   : > { %v1099_v5 = vmul.f32 0.0078125, %v1098_v4 }
 0x8ae   : > { %v1100_v8 = vadd.f32 1e-05, %v1099_v5 }
 0x8b0   : > { %2343 = vrsqrt.f32 %v1100_v8 }
 0x8ba   : > { %v2344_v12 = vpop.eup %2343 }
 0x8bb   : > { %v1102_v13 = vmul.f32 %v2344_v12, %v2987_v42  ;;  %v1181_v42 = vsub.s32 5, %v2896_v35 }
 0x8bd   : > { %v1107_v15 = vmul.f32 %v1106_v11, %v1102_v13  ;;  %v1182_v43 = vrot.slane %v2919_v52, %v1181_v42 }
 0x8bf   : > { %v1112_v16 = vadd.f32 %v1111_v14, %v1107_v15  ;;  %v1197_v44 = vrot.slane %v1182_v43, %v2904_v38 }
 0x8c1   : > { %v1921_v17 = vmul.f32 -1.442695, %v1112_v16 }
 0x8c3   : > { %2345 = vpow2.f32 %v1921_v17 }
 0x8cd   : > { %v2346_v18 = vpop.eup %2345 }
 0x8ce   : > { %v1116_v19 = vadd.f32 1.0, %v2346_v18 }
 0x8d0   : > { %2347 = vrcp.f32 %v1116_v19 }
 0x8da   : > { %v2348_v20 = vpop.eup %2347 }
 0x8db   : > { %v1119_v21 = vmul.f32 %v2348_v20, %v1112_v16 }
 0x8dd   : > { %v1170_v22 = vpack.c.bf16 %v1119_v21, %v1119_v21  ;;  %v2317_v21 = vld [vmem:[#allocation10 + $0x40] sm:$0xff]  }
 0x8df   : > { %1359 = vmatmul.mubr.bf16.vlgmr.msra.gmra.mrb[12].mxu1 %v1170_v22  ;;  %2106 = vmatmul.mubr.bf16.vlgmr.msra.gmra.mrb[20].mxu0 %v1170_v22  ;;  %v2318_v22 = vld [vmem:[#allocation10 + $0x48] sm:$0xff]  }
 0x8e0   : > { %2111 = vmatprep.mubr.msk.bf16.mxu1 %vm2593_vm0, %v2591_v7  ;;  %2129 = vmatprep.mubr.msk.bf16.mxu0 %vm2593_vm0, %v2591_v7 }
 0x9b2   : > { %v1360_v24 = vpop.f32.mrb[12].mxu1  ;;  %v1401_v25 = vpop.f32.mrb[20].mxu0 }
 0x9b3   : > { %v1362_v26 = vpop.f32.mrb[13].mxu1  ;;  %v2107_v27 = vpop.f32.mrb[21].mxu0  ;;  %v1361_v39 = vadd.f32 %v1360_v24, %v1189_v28  ;;  %v1402_v46 = vadd.f32 %v1401_v25, %v1197_v44  ;;  %v2322_v24 = vld [vmem:[#allocation10 + $0x68] sm:$0xff]   ;;  %v2323_v25 = vld [vmem:[#allocation10 + $0x70] sm:$0xff]  }
 0x9b4   : > { %v1363_v29 = vadd.f32 %v1362_v26, %v1193_v23  ;;  %v1364_v30 = vpop.f32.mrb[14].mxu1  ;;  %v1404_v31 = vpop.f32.mrb[22].mxu0  ;;  %v2321_v23 = vld [vmem:[#allocation10 + $0x60] sm:$0xff]   ;;  %v2324_v26 = vld [vmem:[#allocation10 + $0x78] sm:$0xff]  }
 0x9b5   : > { %v1365_v32 = vpop.f32.mrb[15].mxu1  ;;  %v2108_v33 = vpop.f32.mrb[23].mxu0  ;;  %v1411_v41 = vpack.c.bf16 %v1361_v39, %v1361_v39  ;;  %v1423_v48 = vpack.c.bf16 %v1402_v46, %v1402_v46 }
 0x9b6   : > { %v1417_v34 = vpack.c.bf16 %v1363_v29, %v1363_v29  ;;  %1414 = vrot.lane.b32.xlu0 %v1363_v29, %s2594_s23 }
 0x9b7   : > { %v1545_v50 = vsel %vm827_vm2, %v1423_v48, 0 }
 0x9b8   : > { %v1429_v40 = vsel %vm706_vm1, %v1417_v34, 0 }
 0x9b9   : > { %2110 = vmatpush3.bf16.xpose.msra.mxu1 %v1429_v40 }
 0x9ba   : > { %1408 = vrot.lane.b32.xlu0 %v1361_v39, %s2594_s23  ;;  %2115 = vmatprep.subr.bf16.mxu1 %v2591_v7 }
 0x9c0   : > { %2112 = vmatmul.mubr.msk.bf16.vlgmr.msra.gmra.mrb[16].mxu1 %vm706_vm1, %v1411_v41 }
 0x9c1   : > { %2117 = vmatprep.mubr.msk.bf16.mxu1 %vm2593_vm0, %v2591_v7 }
 0xa28   : > { %v1415_v45 = vpop.permute.xlu0 %1414 }
 0xa29   : > { %v1418_v6 = vpack.c.bf16 %v1415_v45, %v1415_v45 }
 0xa2b   : > { %v1475_v36 = vsel %vm706_vm1, %v1418_v6, 0 }
 0xa2c   : > { %2116 = vmatpush3.bf16.xpose.msra.mxu1 %v1475_v36  ;;  %v1409_v47 = vpop.permute.xlu0 %1408 }
 0xa2d   : > { %2121 = vmatprep.subr.bf16.mxu1 %v2591_v7  ;;  %v1412_v49 = vpack.c.bf16 %v1409_v47, %v1409_v47 }
 0xa33   : > { %2118 = vmatmul.mubr.msk.bf16.vlgmr.msra.gmra.mrb[20].mxu1 %vm706_vm1, %v1412_v49 }
 0xa34   : > { %2122 = vmatpush3.bf16.msra.mxu1 %v1545_v50  ;;  %2123 = vmatprep.mubr.msk.bf16.mxu1 %vm2593_vm0, %v2591_v7 }
 0xa35   : > { %2133 = vmatprep.subr.bf16.mxu1 %v2591_v7 }
 0xa93   : > { %v1465_v38 = vpop.f32.mrb[16].mxu1 }
 0xa94   : > { %v2113_v52 = vpop.f32.mrb[17].mxu1  ;;  %v1517_v53 = vsel %vm799_vm3, %v1465_v38, -inf }
 0xa95   : > { %1518 = vmax.xlane.f32.xlu0 %v1517_v53  ;;  %v1468_v54 = vpop.f32.mrb[18].mxu1 }
 0xa96   : > { %v2114_v55 = vpop.f32.mrb[19].mxu1 }
 0xb06   : > { %v1511_v56 = vpop.f32.mrb[20].mxu1 }
 0xb07   : > { %v2119_v57 = vpop.f32.mrb[21].mxu1  ;;  %v1520_v58 = vsel %vm799_vm3, %v1511_v56, -inf }
 0xb08   : > { %1521 = vmax.xlane.f32.xlu1 %v1520_v58  ;;  %v1514_v59 = vpop.f32.mrb[22].mxu1 }
 0xb09   : > { %v2120_v60 = vpop.f32.mrb[23].mxu1 }
 0xb22   : > { %v1519_v2 = vpop.xlane.xlu0 %1518 }
 0xb23   : > { %v1523_v3 = vsub.f32 %v1465_v38, %v1519_v2 }
 0xb25   : > { %v1525_v4 = vmul.f32 1.442695, %v1523_v3 }
 0xb95   : > { %v1522_v61 = vpop.xlane.xlu1 %1521 }
 0xb96   : > { %v1524_v62 = vsub.f32 %v1511_v56, %v1522_v61 }
 0xb98   : > { %v1527_v63 = vmul.f32 1.442695, %v1524_v62 }
 0xb9a   : > { %2349 = vpow2.f32 %v1527_v63 }
 0xb9b   : > { %2351 = vpow2.f32 %v1525_v4 }
 0xba4   : > { %v2350_v0 = vpop.eup %2349 }
 0xba5   : > { %v1532_v1 = vsel %vm799_vm3, %v2350_v0, 0.0  ;;  %v2352_v5 = vpop.eup %2351 }
 0xba6   : > { %1533 = vadd.xlane.f32.xlu1 %v1532_v1  ;;  %v1529_v8 = vsel %vm799_vm3, %v2352_v5, 0.0 }
 0xbb7   : > { %1420 = vrot.lane.b32.xlu1 %v1402_v46, %s2594_s23  ;;  %v2357_v46 = vld [vmem:[%s2858_s18] sm:$0xff]  ;;  %s2595_s18 = smov [#allocation11]  }
 0xbb8   : > { %s2506_s30 = sshll.u32 %s2595_s18, 4  ;;  %s2507_s30 = int_to_ptr.vmem [resolvable:$false] %s2506_s30 }
 0xbb9   : > { %s2508_s16 = scalar_lea.vmem %s2507_s30, 256  ;;  %p2509_p5 = scmp.lt.s32.totalorder %s3065_s22, %s2507_s30 }
 0xbba   : > { %p2510_p9 = scmp.lt.s32.totalorder %s2508_s16, %s2502_s15 }
 0xbbc   : > { %p2511_p1 = por %p2510_p9, %p2509_p5 }
 0xbbe   : > { %p2512_p2 = pnand %p2511_p1, %p2505_p13 }
 0xbdb   : > { %1530 = vadd.xlane.f32.xlu1 %v1529_v8 }
 0xc33   : > { %v1534_v9 = vpop.xlane.xlu1 %1533 }
 0xc34   : > { %2353 = vrcp.f32 %v1534_v9 }
 0xc37   : > { %v1421_v11 = vpop.permute.xlu1 %1420 }
 0xc38   : > { %v1424_v12 = vpack.c.bf16 %v1421_v11, %v1421_v11 }
 0xc3a   : > { %v1591_v13 = vsel %vm827_vm2, %v1424_v12, 0 }
 0xc3b   : > { %2128 = vmatpush3.bf16.msra.mxu0 %v1591_v13 }
 0xc3e   : > { %v2354_v14 = vpop.eup %2353 }
 0xc3f   : > { %v1538_v15 = vmul.f32 %v2354_v14, %v2350_v0 }
 0xc41   : > { %v1540_v16 = vpack.c.bf16 %v1538_v15, %v1538_v15 }
 0xc43   : > { %2130 = vmatmul.mubr.msk.bf16.vlgmr.msra.gmra.mrb[24].mxu0 %vm799_vm3, %v1540_v16 }
 0xc68   : > { %v1531_v17 = vpop.xlane.xlu1 %1530 }
 0xc69   : > { %2355 = vrcp.f32 %v1531_v17 }
 0xc73   : > { %v2356_v18 = vpop.eup %2355 }
 0xc74   : > { %v1537_v19 = vmul.f32 %v2356_v18, %v2352_v5 }
 0xc76   : > { %v1539_v20 = vpack.c.bf16 %v1537_v19, %v1537_v19 }
 0xc78   : > { %2124 = vmatmul.mubr.msk.bf16.vlgmr.msra.gmra.mrb[24].mxu1 %vm799_vm3, %v1539_v20 }
 0xc79   : > { %2149 = vmatprep.mubr.msk.bf16.mxu1 %vm2593_vm0, %v2591_v7  ;;  %2134 = vmatpush3.bf16.msra.mxu1 %v2317_v21 }
 0xc7a   : > { %2135 = vmatprep.subr.bf16.mxu1 %v2591_v7 }
 0xc7d   : > { %2136 = vmatpush3.bf16.msra.mxu1 %v2318_v22 }
 0xc7e   : > { %2137 = vmatprep.subr.bf16.mxu1 %v2591_v7 }
 0xc81   : > { %2138 = vmatpush3.bf16.msra.mxu1 %v2319_v51 }
 0xc82   : > { %2139 = vmatprep.subr.bf16.mxu1 %v2591_v7 }
 0xc85   : > { %2140 = vmatpush3.bf16.msra.mxu1 %v2320_v10 }
 0xc86   : > { %2141 = vmatprep.subr.bf16.mxu1 %v2591_v7 }
 0xc89   : > { %2142 = vmatpush3.bf16.msra.mxu1 %v2321_v23 }
 0xc8a   : > { %2143 = vmatprep.subr.bf16.mxu1 %v2591_v7 }
 0xc8d   : > { %2144 = vmatpush3.bf16.msra.mxu1 %v2322_v24 }
 0xc8e   : > { %2145 = vmatprep.subr.bf16.mxu1 %v2591_v7 }
 0xc91   : > { %2146 = vmatpush3.bf16.msra.mxu1 %v2323_v25 }
 0xc92   : > { %2147 = vmatprep.subr.bf16.mxu1 %v2591_v7  ;;  %v1642_v7 = vrot.slane %v2901_v37, %v1181_v42 }
 0xc95   : > { %2148 = vmatpush3.bf16.msra.mxu1 %v2324_v26 }
 0xd16   : > { %v1627_v27 = vpop.f32.mrb[24].mxu0 }
 0xd17   : > { %1634 = vrot.lane.b32.xlu0 %v1627_v27, %s2594_s23  ;;  %v2131_v28 = vpop.f32.mrb[25].mxu0 }
 0xd18   : > { %v1630_v29 = vpop.f32.mrb[26].mxu0 }
 0xd19   : > { %v2132_v30 = vpop.f32.mrb[27].mxu0 }
 0xd4b   : > { %v1581_v31 = vpop.f32.mrb[24].mxu1 }
 0xd4c   : > { %v2125_v32 = vpop.f32.mrb[25].mxu1 }
 0xd4d   : > { %v1584_v33 = vpop.f32.mrb[26].mxu1 }
 0xd4e   : > { %v2126_v34 = vpop.f32.mrb[27].mxu1 }
 0xd89   : > { %v1635_v39 = vpop.permute.xlu0 %1634 }
 0xd8a   : > { %v1637_v40 = vsel %vm706_vm1, %v1581_v31, %v1635_v39 }
 0xd8b   : > { %v1638_v41 = vpack.c.bf16 %v1637_v40, %v1637_v40 }
 0xd8d   : > { %2150 = vmatmul.mubr.bf16.vlgmr.msra.gmra.mrb[28].mxu1 %v1638_v41 }
 0xe60   : > { %v1725_v43 = vpop.f32.mrb[28].mxu1 }
 0xe61   : > { %v1726_v44 = vadd.f32 %v1725_v43, %v1642_v7  ;;  %v2151_v45 = vpop.f32.mrb[29].mxu1 }
 0xe62   : > { %v1728_v6 = vpop.f32.mrb[30].mxu1 }
 0xe63   : > { %v1731_v36 = vadd.f32 %v2357_v46, %v1726_v44  ;;  %v2152_v47 = vpop.f32.mrb[31].mxu1 }
 0xe65   : > { %1732 = vst [vmem:[%s368_s11] sm:$0xff] %v1731_v36 }
 0xe66   : > { %2515 = shalt.err (!%p2512_p2)
}
 0xe67   : > { %s2516_s2 = scalar_lea.hbm %s3063_s10, 128  ;;  %s2520_s29 = scalar_lea.hbm %s3114_s7, 256 }
 0xe68   : > { %p2517_p12 = scmp.ne.s32.totalorder %s3063_s10, %s2516_s2  ;;  %p2521_p0 = scmp.lt.u32.totalorder %s3063_s10, %s3114_s7 }
 0xe69   : > { %p2522_p4 = scmp.lt.u32.totalorder %s2520_s29, %s2516_s2  ;;  %p2524_p3 = scmp.lt.u32.totalorder %s2516_s2, %s3063_s10 }
 0xe6a   : > { %p2518_p6 = pnand %p2517_p12, %p3138_p7 }
 0xe6b   : > { %p2523_p8 = por %p2522_p4, %p2521_p0 }
 0xe6c   : > { %p2519_p11 = pneg %p2518_p6 }
 0xe6d   : > { %p2525_p10 = por %p2524_p3, %p2523_p8 }
 0xe6f   : > { %p2526_p13 = pnand %p2525_p10, %p2519_p11 }
 0xe71   : > { %2529 = shalt.err (!%p2526_p13)
}
 0xe72   : > { %2169 = dma.vmem_to_hbm [thread:$0]  (%p3138_p7), %s3065_s22, 128, %s3063_s10, %s1734_s28  }
 0xe73 PF: > { %s1759_s12 = sand.u32 1, %s2568_s24   ;;  %p3139_p5 = scmp.ne.s32.totalorder %s3122_s8, 0 }
 0xe74   : > { %p3140_p9 = scmp.ge.s32.totalorder %s2580_s27, 2  ;;  %s1760_s11 = scalar_lea.sflag [#allocation4], %s1759_s12 }
 0xe76   : > { %p2189_p1 = pnand %p3140_p9, %p3139_p5 }
 0xe78   : > { %2563 = dma.done.wait (!%p2189_p1), %s1760_s11, 128  }
 0xe79   : > { %2565 = vsyncadd (!%p2189_p1), %s1760_s11, 4294967168  ;;  %p24_p2 = scmp.ge.s32.totalorder %s2760_s17, 4   ;;  %s3141_s24 = smov %s2572_s25 }
 0xe7a   : > { %s3142_s25 = smov %s2576_s26  ;;  %s3143_s26 = smov %s2770_s20 }
 0xe7b   : > { %s3144_s27 = smov %s2760_s17  ;;  %26 = sbr.rel (!%p24_p2) target bundleno = 11 (0xb), region = 120 }
 0xe82   :  { %1765 = vsyncpa [#allocation3], 1 }
 0xe83   :  { %1767 = vsyncpa [#allocation3 + $0x1], 1 }
 0xe84   :  { %1768 = vsyncpa [#allocation6], 1 }
 0xe85   :  { %1770 = vsyncpa [#allocation6 + $0x1], 1 }
 0xe86   :  { %1771 = vsyncpa [#allocation9], 1 }
 0xe87   :  { %1772 = vsyncpa [#allocation4], 1 }
 0xe88   :  { %1774 = vsyncpa [#allocation4 + $0x1], 1 }

</bundles_post_ra>
